<compile_context>
chip_gen: v6e
topology: v6e:2x2x1
jax: 0.10.0
libtpu: 0.0.40
codegen_flags: <defaults>
</compile_context>

<pallas_src>
import jax
import jax.numpy as jnp
from jax import lax
from jax.experimental import pallas as pl
from jax.experimental.pallas import tpu as pltpu

EPS = 1e-12  # F.normalize default eps


def embednet_kernel(x_ref, wb_ref, bb_ref, wv_ref, bv_ref, cent_ref, out_ref,
                    agg_ref, asum_ref):
    si = pl.program_id(1)

    b, st, c = x_ref.shape          # (B_TILE, S_TILE, Cin_p)
    d = wb_ref.shape[1]
    k = wv_ref.shape[1]

    @pl.when(si == 0)
    def _():
        agg_ref[...] = jnp.zeros_like(agg_ref)
        asum_ref[...] = jnp.zeros_like(asum_ref)

    # Merge (batch, spatial) -> rows; leading-dim merge is layout-free.
    x2 = x_ref[...].reshape(b * st, c)

    # ---- base_model: 1x1 conv + ReLU -> (b*st, D) ----
    feat = jnp.dot(x2, wb_ref[...], preferred_element_type=jnp.float32) + bb_ref[...]
    feat = jnp.maximum(feat, 0.0)

    # ---- NetVLAD (per-spatial-tile work) ----
    # L2-normalize descriptors over channels (F.normalize(x, p=2, dim=1)):
    # x * rsqrt(max(sumsq, eps^2)) == x / max(||x||, eps); rsqrt runs on the EUP.
    inv_n = lax.rsqrt(jnp.maximum(jnp.sum(feat * feat, axis=-1, keepdims=True),
                                  EPS * EPS))
    xn = feat * inv_n                                            # (b*st, D)

    # Soft assignment: 1x1 conv (D -> K), max-shifted softmax over clusters.
    # Max-shift kept for trained-weight logit scales; denominator is exact.
    logits = jnp.dot(xn, wv_ref[...], preferred_element_type=jnp.float32) + bv_ref[...]
    logits = logits - jnp.max(logits, axis=-1, keepdims=True)
    e = jnp.exp(logits)
    sa = e / jnp.sum(e, axis=-1, keepdims=True)                  # (b*st, K)

    # Accumulate sufficient statistics across spatial tiles:
    #   vlad[b,k,d] = sum_s sa[b,s,k]*(xn[b,s,d] - c[k,d])
    #              = agg[b,k,d] - c[k,d]*asum[b,k]
    sa3 = sa.reshape(b, st, k)
    xn3 = xn.reshape(b, st, d)
    # Note: contraction is on the (non-minor) s axis of the (st, K=8) operand;
    # keeping sa3 on the LHS makes any inserted XLU transpose the small-K one.
    agg_ref[...] += lax.dot_general(sa3, xn3, (((1,), (1,)), ((0,), (0,))),
                                    preferred_element_type=jnp.float32)
    asum_ref[...] += jnp.sum(sa3, axis=1)

    @pl.when(si == pl.num_programs(1) - 1)
    def _():
        vlad = agg_ref[...] - cent_ref[...][None] * asum_ref[...][:, :, None]
        # Intra-normalization (per cluster), EUP rsqrt.
        sumsq = jnp.sum(vlad * vlad, axis=-1, keepdims=True)              # (b, K, 1)
        inv_k = lax.rsqrt(jnp.maximum(sumsq, EPS * EPS))
        vlad = vlad * inv_k
        # Global L2 per sample from the per-cluster sums (no second XLU reduce
        # over D): sum_k sumsq_k * inv_k^2 == sumsq of the intra-normalized rows.
        gsq = jnp.sum(sumsq * (inv_k * inv_k), axis=1, keepdims=True)     # (b, 1, 1)
        vlad = vlad * lax.rsqrt(jnp.maximum(gsq, EPS * EPS))
        # Lane-dense store: (b, K*D) with K*D a multiple of 128 -> unmasked vst.
        out_ref[0] = vlad.reshape(b, k * d).astype(out_ref.dtype)


def _vmem_budget():
    """Per-chip (vmem_budget_bytes, min_parallel_programs)."""
    cap = None
    try:
        cap = int(pltpu.get_tpu_info().vmem_capacity_bytes)
    except Exception:
        cap = None
    if cap is None or cap <= 0:
        cap = 64 * 2 ** 20                       # conservative: assume v7x-class
    if cap <= 64 * 2 ** 20:
        # v7x-class: 64 MiB physical, 2 TensorCores -> ~25% headroom for Mosaic
        # scratch, and keep >=2 grid programs on the parallel axis.
        return (cap * 3) // 4, 2
    # v5e/v6e-class: 128 MiB physical, single TensorCore -> large blocks; whole
    # batch in one grid step is fine.
    return min(112 * 2 ** 20, (cap * 7) // 8), 1


def _pick_tiles(N, S, Cin_p, D, K, budget_bytes, min_programs):
    """Largest (b_tile, s_tile) whose honest (lane-padded) footprint fits."""
    lane = lambda n: -(-n // 128) * 128
    sub = lambda n: -(-n // 8) * 8

    def step_bytes(bt, st):
        rows = bt * st
        per_row = (2 * lane(Cin_p)          # x tile: double-buffered, lane-padded
                   + 2 * lane(D)            # feat, xn
                   + 3 * lane(K))           # logits / exp / softmax assignment
        fixed = (bt * sub(K) * lane(D)      # agg accumulator scratch
                 + sub(bt) * lane(K)        # asum accumulator scratch
                 + 2 * bt * lane(K * D)     # output slab, double-buffered
                 + 2 * (sub(Cin_p) * lane(D) + sub(D) * lane(K)
                        + sub(K) * lane(D) + lane(D) + lane(K)))  # params x2 bufs
        return 4 * (rows * per_row + fixed)

    b_cands = [bt for bt in range(N, 0, -1)
               if N % bt == 0 and (N // bt) >= min_programs]
    if not b_cands:
        b_cands = [N]
    s_cands = [st for st in range(S, 0, -1)
               if S % st == 0 and (st == S or st % 8 == 0)]
    if not s_cands:
        s_cands = [S]

    for bt in b_cands:
        for st in s_cands:
            if step_bytes(bt, st) <= budget_bytes:
                return bt, st, step_bytes(bt, st)
    bt, st = b_cands[-1], s_cands[-1]
    return bt, st, step_bytes(bt, st)


def embed_net(x_nchw, wb, bb, wv, bv, centroids, b_tile=None, s_tile=None):
    """x_nchw: [N, Cin, H, W] float32. Returns [N, K*D] float32."""
    N, Cin, H, W = x_nchw.shape
    S = H * W
    D = wb.shape[1]
    K = wv.shape[1]
    KD = K * D

    # Pad channels to a multiple of 8 (min 8); zero-padded wb rows keep the
    # result exact while improving sublane/MXU utilization of the first matmul.
    Cin_p = max(8, -(-Cin // 8) * 8)

    budget, min_programs = _vmem_budget()
    bt_auto, st_auto, need = _pick_tiles(N, S, Cin_p, D, K, budget, min_programs)
    b_tile = b_tile or bt_auto
    s_tile = s_tile or st_auto
    assert N % b_tile == 0 and S % s_tile == 0
    num_b = N // b_tile
    num_s = S // s_tile

    # Glue: NCHW -> [N, S, Cin_p] (channel-last, spatial flattened row-major).
    x = jnp.transpose(x_nchw, (0, 2, 3, 1)).reshape(N, S, Cin)
    if Cin_p != Cin:
        x = jnp.pad(x, ((0, 0), (0, 0), (0, Cin_p - Cin)))
        wb = jnp.pad(wb, ((0, Cin_p - Cin), (0, 0)))

    # Explicit VMEM limit: generous vs. the measured need, capped per chip.
    vmem_limit = int(min(budget, max(2 * need, 16 * 2 ** 20)))

    # TODO(synk): if a bundle dump shows exposed x DMA at large S, switch the x
    # BlockSpec to pipeline_mode=pl.Buffered(3) (plenty of budget headroom here).

    out = pl.pallas_call(
        embednet_kernel,
        out_shape=jax.ShapeDtypeStruct((num_b, b_tile, KD), jnp.float32),
        grid=(num_b, num_s),
        in_specs=[
            pl.BlockSpec((b_tile, s_tile, Cin_p), lambda n, s: (n, s, 0)),  # x stream
            pl.BlockSpec((Cin_p, D), lambda n, s: (0, 0)),                  # base conv W
            pl.BlockSpec((1, D), lambda n, s: (0, 0)),                      # base conv b
            pl.BlockSpec((D, K), lambda n, s: (0, 0)),                      # vlad conv W
            pl.BlockSpec((1, K), lambda n, s: (0, 0)),                      # vlad conv b
            pl.BlockSpec((K, D), lambda n, s: (0, 0)),                      # centroids
        ],
        out_specs=pl.BlockSpec((1, b_tile, KD), lambda n, s: (n, 0, 0)),
        scratch_shapes=[pltpu.VMEM((b_tile, K, D), jnp.float32),   # agg
                        pltpu.VMEM((b_tile, K), jnp.float32)],     # asum
        compiler_params=pltpu.CompilerParams(
            dimension_semantics=("parallel", "arbitrary"),
            vmem_limit_bytes=vmem_limit),
    )(x, wb, bb, wv, bv, centroids)

    return out.reshape(N, KD)


def embed_net_ref(x_nchw, wb, bb, wv, bv, centroids):
    """Pure-JAX reference mirroring the PyTorch forward."""
    N, Cin, H, W = x_nchw.shape
    x = jnp.transpose(x_nchw, (0, 2, 3, 1)).reshape(N, H * W, Cin)
    feat = jnp.maximum(jnp.einsum('nsc,cd->nsd', x, wb) + bb, 0.0)
    xn = feat / jnp.maximum(jnp.linalg.norm(feat, axis=-1, keepdims=True), EPS)
    logits = jnp.einsum('nsd,dk->nsk', xn, wv) + bv
    sa = jax.nn.softmax(logits, axis=-1)
    vlad = jnp.einsum('nsk,nsd->nkd', sa, xn) - centroids[None] * jnp.sum(sa, axis=1)[..., None]
    vlad = vlad / jnp.maximum(jnp.linalg.norm(vlad, axis=-1, keepdims=True), EPS)
    vlad = vlad.reshape(N, -1)
    vlad = vlad / jnp.maximum(jnp.linalg.norm(vlad, axis=-1, keepdims=True), EPS)
    return vlad


if __name__ == "__main__":
    # Small shapes: batch=2, Cin=4, spatial 16x16, feature dim D=32, clusters K=8
    N, Cin, H, W = 2, 4, 16, 16
    D, K = 32, 8

    key = jax.random.PRNGKey(0)
    k0, k1, k2, k3, k4, k5 = jax.random.split(key, 6)

    x = jax.random.normal(k0, (N, Cin, H, W), dtype=jnp.float32)

    # base_model params: 1x1 conv (Cin -> D) + bias
    wb = jax.random.normal(k1, (Cin, D), dtype=jnp.float32) * 0.1
    bb = jax.random.normal(k2, (1, D), dtype=jnp.float32) * 0.01
    # NetVLAD params: 1x1 conv (D -> K) + bias, centroids (K, D)
    wv = jax.random.normal(k3, (D, K), dtype=jnp.float32) * 0.1
    bv = jax.random.normal(k4, (1, K), dtype=jnp.float32) * 0.01
    centroids = jax.random.uniform(k5, (K, D), dtype=jnp.float32)

    out = embed_net(x, wb, bb, wv, bv, centroids)
    out = jax.block_until_ready(out)

    ref = embed_net_ref(x, wb, bb, wv, bv, centroids)
    assert out.shape == (N, K * D)
    assert jnp.allclose(out, ref, rtol=1e-3, atol=1e-4), "mismatch vs JAX reference"

    print("KERNEL_OK")
</pallas_src>

<mosaic_0001>
module attributes {stable_mosaic.version = 11 : i64} {
  func.func @embednet_kernel(%arg0: i32, %arg1: i32, %arg2: memref<1x256x8xf32, #tpu.memory_space<vmem>>, %arg3: memref<8x32xf32, #tpu.memory_space<vmem>>, %arg4: memref<1x32xf32, #tpu.memory_space<vmem>>, %arg5: memref<32x8xf32, #tpu.memory_space<vmem>>, %arg6: memref<1x8xf32, #tpu.memory_space<vmem>>, %arg7: memref<8x32xf32, #tpu.memory_space<vmem>>, %arg8: memref<1x1x256xf32, #tpu.memory_space<vmem>>, %arg9: memref<1x8x32xf32, #tpu.memory_space<vmem>>, %arg10: memref<1x8xf32, #tpu.memory_space<vmem>>) attributes {dimension_semantics = [#tpu.dimension_semantics<parallel>, #tpu.dimension_semantics<arbitrary>], iteration_bounds = array<i64: 2, 1>, scalar_prefetch = 0 : i64, scratch_operands = 2 : i64, tpu.core_type = #tpu.core_type<tc>, window_params = [{transform_indices = @transform_0, window_bounds = array<i64: 1, 256, 8>}, {pipeline_mode = #tpu.pipeline_mode<synchronous>, transform_indices = @transform_1, window_bounds = array<i64: 8, 32>}, {pipeline_mode = #tpu.pipeline_mode<synchronous>, transform_indices = @transform_2, window_bounds = array<i64: 1, 32>}, {pipeline_mode = #tpu.pipeline_mode<synchronous>, transform_indices = @transform_3, window_bounds = array<i64: 32, 8>}, {pipeline_mode = #tpu.pipeline_mode<synchronous>, transform_indices = @transform_4, window_bounds = array<i64: 1, 8>}, {pipeline_mode = #tpu.pipeline_mode<synchronous>, transform_indices = @transform_5, window_bounds = array<i64: 8, 32>}, {transform_indices = @transform_6, window_bounds = array<i64: 1, 1, 256>}]} {
    %c0_i32 = arith.constant 0 : i32
    %0 = arith.cmpi eq, %arg1, %c0_i32 : i32
    %1 = arith.extui %0 : i1 to i32
    %c0_i32_0 = arith.constant 0 : i32
    %2 = arith.cmpi ne, %1, %c0_i32_0 : i32
    scf.if %2 {
      %cst_31 = arith.constant 0.000000e+00 : f32
      %47 = vector.broadcast %cst_31 : f32 to vector<1x8x32xf32>
      %c0_32 = arith.constant 0 : index
      %c0_33 = arith.constant 0 : index
      %c0_34 = arith.constant 0 : index
      %48 = vector.load %arg9[%c0_32, %c0_33, %c0_34] : memref<1x8x32xf32, #tpu.memory_space<vmem>>, vector<1x8x32xf32>
      tpu.vector_store %arg9[%c0_32, %c0_33, %c0_34], %47 {strides = array<i32>} : memref<1x8x32xf32, #tpu.memory_space<vmem>>, vector<1x8x32xf32>,
      %cst_35 = arith.constant 0.000000e+00 : f32
      %49 = vector.broadcast %cst_35 : f32 to vector<1x8xf32>
      %c0_36 = arith.constant 0 : index
      %c0_37 = arith.constant 0 : index
      %50 = vector.load %arg10[%c0_36, %c0_37] : memref<1x8xf32, #tpu.memory_space<vmem>>, vector<1x8xf32>
      tpu.vector_store %arg10[%c0_36, %c0_37], %49 {strides = array<i32>} : memref<1x8xf32, #tpu.memory_space<vmem>>, vector<1x8xf32>,
    } else {
    }
    %c0 = arith.constant 0 : index
    %c0_1 = arith.constant 0 : index
    %c0_2 = arith.constant 0 : index
    %3 = vector.load %arg2[%c0, %c0_1, %c0_2] : memref<1x256x8xf32, #tpu.memory_space<vmem>>, vector<1x256x8xf32>
    %4 = vector.shape_cast %3 : vector<1x256x8xf32> to vector<256x8xf32>
    %c0_3 = arith.constant 0 : index
    %c0_4 = arith.constant 0 : index
    %5 = vector.load %arg3[%c0_3, %c0_4] : memref<8x32xf32, #tpu.memory_space<vmem>>, vector<8x32xf32>
    %cst = arith.constant dense<0.000000e+00> : vector<256x32xf32>
    %6 = tpu.matmul %4, %5, %cst {dimension_numbers = #tpu.dot_dimension_numbers<[1], [0], [0], [1], [0, 0, 1, 1], [], []>} : vector<256x8xf32>, vector<8x32xf32>, vector<256x32xf32> -> vector<256x32xf32>
    %c0_5 = arith.constant 0 : index
    %c0_6 = arith.constant 0 : index
    %7 = vector.load %arg4[%c0_5, %c0_6] : memref<1x32xf32, #tpu.memory_space<vmem>>, vector<1x32xf32>
    %8 = vector.broadcast %7 : vector<1x32xf32> to vector<256x32xf32>
    %9 = arith.addf %6, %8 : vector<256x32xf32>
    %cst_7 = arith.constant 0.000000e+00 : f32
    %10 = vector.broadcast %cst_7 : f32 to vector<256x32xf32>
    %11 = arith.maximumf %9, %10 : vector<256x32xf32>
    %12 = arith.mulf %11, %11 : vector<256x32xf32>
    %cst_8 = arith.constant dense<0.000000e+00> : vector<256xf32>
    %13 = vector.multi_reduction <add>, %12, %cst_8 [1] : vector<256x32xf32> to vector<256xf32>
    %14 = vector.shape_cast %13 : vector<256xf32> to vector<256x1xf32>
    %cst_9 = arith.constant 1.000000e-24 : f32
    %15 = vector.broadcast %cst_9 : f32 to vector<256x1xf32>
    %16 = arith.maximumf %14, %15 : vector<256x1xf32>
    %17 = math.rsqrt %16 : vector<256x1xf32>
    %18 = vector.broadcast %17 : vector<256x1xf32> to vector<256x32xf32>
    %19 = arith.mulf %11, %18 : vector<256x32xf32>
    %c0_10 = arith.constant 0 : index
    %c0_11 = arith.constant 0 : index
    %20 = vector.load %arg5[%c0_10, %c0_11] : memref<32x8xf32, #tpu.memory_space<vmem>>, vector<32x8xf32>
    %cst_12 = arith.constant dense<0.000000e+00> : vector<256x8xf32>
    %21 = tpu.matmul %19, %20, %cst_12 {dimension_numbers = #tpu.dot_dimension_numbers<[1], [0], [0], [1], [0, 0, 1, 1], [], []>} : vector<256x32xf32>, vector<32x8xf32>, vector<256x8xf32> -> vector<256x8xf32>
    %c0_13 = arith.constant 0 : index
    %c0_14 = arith.constant 0 : index
    %22 = vector.load %arg6[%c0_13, %c0_14] : memref<1x8xf32, #tpu.memory_space<vmem>>, vector<1x8xf32>
    %23 = vector.broadcast %22 : vector<1x8xf32> to vector<256x8xf32>
    %24 = arith.addf %21, %23 : vector<256x8xf32>
    %cst_15 = arith.constant dense<0xFF800000> : vector<256xf32>
    %25 = vector.multi_reduction <maximumf>, %24, %cst_15 [1] : vector<256x8xf32> to vector<256xf32>
    %26 = vector.shape_cast %25 : vector<256xf32> to vector<256x1xf32>
    %27 = vector.broadcast %26 : vector<256x1xf32> to vector<256x8xf32>
    %28 = arith.subf %24, %27 : vector<256x8xf32>
    %29 = math.exp %28 : vector<256x8xf32>
    %cst_16 = arith.constant dense<0.000000e+00> : vector<256xf32>
    %30 = vector.multi_reduction <add>, %29, %cst_16 [1] : vector<256x8xf32> to vector<256xf32>
    %31 = vector.shape_cast %30 : vector<256xf32> to vector<256x1xf32>
    %32 = vector.broadcast %31 : vector<256x1xf32> to vector<256x8xf32>
    %33 = arith.divf %29, %32 : vector<256x8xf32>
    %34 = vector.shape_cast %33 : vector<256x8xf32> to vector<1x256x8xf32>
    %35 = vector.shape_cast %19 : vector<256x32xf32> to vector<1x256x32xf32>
    %c0_17 = arith.constant 0 : index
    %c0_18 = arith.constant 0 : index
    %c0_19 = arith.constant 0 : index
    %36 = vector.load %arg9[%c0_17, %c0_18, %c0_19] : memref<1x8x32xf32, #tpu.memory_space<vmem>>, vector<1x8x32xf32>
    %cst_20 = arith.constant dense<0.000000e+00> : vector<1x8x32xf32>
    %37 = tpu.matmul %34, %35, %cst_20 {dimension_numbers = #tpu.dot_dimension_numbers<[1], [1], [2], [2], [0, 0, 0, 2, 1, 2], [0], [0]>} : vector<1x256x8xf32>, vector<1x256x32xf32>, vector<1x8x32xf32> -> vector<1x8x32xf32>
    %38 = arith.addf %36, %37 : vector<1x8x32xf32>
    %c0_21 = arith.constant 0 : index
    %c0_22 = arith.constant 0 : index
    %c0_23 = arith.constant 0 : index
    %39 = vector.load %arg9[%c0_21, %c0_22, %c0_23] : memref<1x8x32xf32, #tpu.memory_space<vmem>>, vector<1x8x32xf32>
    tpu.vector_store %arg9[%c0_21, %c0_22, %c0_23], %38 {strides = array<i32>} : memref<1x8x32xf32, #tpu.memory_space<vmem>>, vector<1x8x32xf32>,
    %c0_24 = arith.constant 0 : index
    %c0_25 = arith.constant 0 : index
    %40 = vector.load %arg10[%c0_24, %c0_25] : memref<1x8xf32, #tpu.memory_space<vmem>>, vector<1x8xf32>
    %cst_26 = arith.constant dense<0.000000e+00> : vector<1x8xf32>
    %41 = vector.multi_reduction <add>, %34, %cst_26 [1] : vector<1x256x8xf32> to vector<1x8xf32>
    %42 = arith.addf %40, %41 : vector<1x8xf32>
    %c0_27 = arith.constant 0 : index
    %c0_28 = arith.constant 0 : index
    %43 = vector.load %arg10[%c0_27, %c0_28] : memref<1x8xf32, #tpu.memory_space<vmem>>, vector<1x8xf32>
    tpu.vector_store %arg10[%c0_27, %c0_28], %42 {strides = array<i32>} : memref<1x8xf32, #tpu.memory_space<vmem>>, vector<1x8xf32>,
    %c0_i32_29 = arith.constant 0 : i32
    %44 = arith.cmpi eq, %arg1, %c0_i32_29 : i32
    %45 = arith.extui %44 : i1 to i32
    %c0_i32_30 = arith.constant 0 : i32
    %46 = arith.cmpi ne, %45, %c0_i32_30 : i32
    scf.if %46 {
      %c0_31 = arith.constant 0 : index
      %c0_32 = arith.constant 0 : index
      %c0_33 = arith.constant 0 : index
      %47 = vector.load %arg9[%c0_31, %c0_32, %c0_33] : memref<1x8x32xf32, #tpu.memory_space<vmem>>, vector<1x8x32xf32>
      %c0_34 = arith.constant 0 : index
      %c0_35 = arith.constant 0 : index
      %48 = vector.load %arg7[%c0_34, %c0_35] : memref<8x32xf32, #tpu.memory_space<vmem>>, vector<8x32xf32>
      %49 = vector.shape_cast %48 : vector<8x32xf32> to vector<1x8x32xf32>
      %c0_36 = arith.constant 0 : index
      %c0_37 = arith.constant 0 : index
      %50 = vector.load %arg10[%c0_36, %c0_37] : memref<1x8xf32, #tpu.memory_space<vmem>>, vector<1x8xf32>
      %51 = vector.shape_cast %50 : vector<1x8xf32> to vector<1x8x1xf32>
      %52 = vector.broadcast %51 : vector<1x8x1xf32> to vector<1x8x32xf32>
      %53 = arith.mulf %49, %52 : vector<1x8x32xf32>
      %54 = arith.subf %47, %53 : vector<1x8x32xf32>
      %55 = arith.mulf %54, %54 : vector<1x8x32xf32>
      %cst_38 = arith.constant dense<0.000000e+00> : vector<1x8xf32>
      %56 = vector.multi_reduction <add>, %55, %cst_38 [2] : vector<1x8x32xf32> to vector<1x8xf32>
      %57 = vector.shape_cast %56 : vector<1x8xf32> to vector<1x8x1xf32>
      %cst_39 = arith.constant 1.000000e-24 : f32
      %58 = vector.broadcast %cst_39 : f32 to vector<1x8x1xf32>
      %59 = arith.maximumf %57, %58 : vector<1x8x1xf32>
      %60 = math.rsqrt %59 : vector<1x8x1xf32>
      %61 = vector.broadcast %60 : vector<1x8x1xf32> to vector<1x8x32xf32>
      %62 = arith.mulf %54, %61 : vector<1x8x32xf32>
      %63 = arith.mulf %60, %60 : vector<1x8x1xf32>
      %64 = arith.mulf %57, %63 : vector<1x8x1xf32>
      %cst_40 = arith.constant dense<0.000000e+00> : vector<1x1xf32>
      %65 = vector.multi_reduction <add>, %64, %cst_40 [1] : vector<1x8x1xf32> to vector<1x1xf32>
      %66 = vector.shape_cast %65 : vector<1x1xf32> to vector<1x1x1xf32>
      %cst_41 = arith.constant 1.000000e-24 : f32
      %67 = vector.broadcast %cst_41 : f32 to vector<1x1x1xf32>
      %68 = arith.maximumf %66, %67 : vector<1x1x1xf32>
      %69 = math.rsqrt %68 : vector<1x1x1xf32>
      %70 = vector.broadcast %69 : vector<1x1x1xf32> to vector<1x8x32xf32>
      %71 = arith.mulf %62, %70 : vector<1x8x32xf32>
      %72 = vector.shape_cast %71 : vector<1x8x32xf32> to vector<1x256xf32>
      %c0_42 = arith.constant 0 : index
      %c0_43 = arith.constant 0 : index
      %c0_44 = arith.constant 0 : index
      %73 = vector.load %arg8[%c0_42, %c0_43, %c0_44] : memref<1x1x256xf32, #tpu.memory_space<vmem>>, vector<1x1x256xf32>
      %74 = vector.shape_cast %73 : vector<1x1x256xf32> to vector<1x256xf32>
      %75 = vector.shape_cast %72 : vector<1x256xf32> to vector<1x1x256xf32>
      tpu.vector_store %arg8[%c0_42, %c0_43, %c0_44], %75 {strides = array<i32>} : memref<1x1x256xf32, #tpu.memory_space<vmem>>, vector<1x1x256xf32>,
    } else {
    }
    return
  }
  func.func @transform_0(%arg0: i32, %arg1: i32) -> (i32, i32, i32) {
    %c0_i32 = arith.constant 0 : i32
    %c0_i32_0 = arith.constant 0 : i32
    return %arg0, %arg1, %c0_i32 : i32, i32, i32
  }
  func.func @transform_1(%arg0: i32, %arg1: i32) -> (i32, i32) {
    %c0_i32 = arith.constant 0 : i32
    %c0_i32_0 = arith.constant 0 : i32
    %c0_i32_1 = arith.constant 0 : i32
    return %c0_i32, %c0_i32_0 : i32, i32
  }
  func.func @transform_2(%arg0: i32, %arg1: i32) -> (i32, i32) {
    %c0_i32 = arith.constant 0 : i32
    %c0_i32_0 = arith.constant 0 : i32
    %c0_i32_1 = arith.constant 0 : i32
    return %c0_i32, %c0_i32_0 : i32, i32
  }
  func.func @transform_3(%arg0: i32, %arg1: i32) -> (i32, i32) {
    %c0_i32 = arith.constant 0 : i32
    %c0_i32_0 = arith.constant 0 : i32
    %c0_i32_1 = arith.constant 0 : i32
    return %c0_i32, %c0_i32_0 : i32, i32
  }
  func.func @transform_4(%arg0: i32, %arg1: i32) -> (i32, i32) {
    %c0_i32 = arith.constant 0 : i32
    %c0_i32_0 = arith.constant 0 : i32
    %c0_i32_1 = arith.constant 0 : i32
    return %c0_i32, %c0_i32_0 : i32, i32
  }
  func.func @transform_5(%arg0: i32, %arg1: i32) -> (i32, i32) {
    %c0_i32 = arith.constant 0 : i32
    %c0_i32_0 = arith.constant 0 : i32
    %c0_i32_1 = arith.constant 0 : i32
    return %c0_i32, %c0_i32_0 : i32, i32
  }
  func.func @transform_6(%arg0: i32, %arg1: i32) -> (i32, i32, i32) {
    %c0_i32 = arith.constant 0 : i32
    %c0_i32_0 = arith.constant 0 : i32
    %c0_i32_1 = arith.constant 0 : i32
    return %arg0, %c0_i32, %c0_i32_0 : i32, i32, i32
  }
}

</mosaic_0001>

<bundles_post_ra>
// kernel: tpu_custom_call.1
= control target key start
LH: loop header
LB: loop body
LE: loop exit
PB: predicated region body
PF: predicated region fallthrough
CT: control target
= control target key end

     0   :  { %11 = vsyncpa [#allocation5], 0  ;;  %s3733_s0 = inlined_call_operand.vmem [shape: f32[2,256,8], index: 0, kind: input, shape index: {}]   ;;  %s3734_s1 = inlined_call_operand.vmem [shape: f32[8,32], index: 1, kind: input, shape index: {}]   ;;  %s3735_s2 = inlined_call_operand.vmem [shape: f32[1,32], index: 2, kind: input, shape index: {}]   ;;  %s3736_s3 = inlined_call_operand.vmem [shape: f32[32,8], index: 3, kind: input, shape index: {}]   ;;  %s3737_s4 = inlined_call_operand.vmem [shape: f32[1,8], index: 4, kind: input, shape index: {}]   ;;  %s3738_s5 = inlined_call_operand.vmem [shape: f32[8,32], index: 5, kind: input, shape index: {}]   ;;  %s3739_s6 = inlined_call_operand.hbm [shape: f32[2,1,256], index: 6, kind: output, shape index: {}]  }
   0x1   :  { %13 = vsyncpa [#allocation5 + $0x1], 0  ;;  %s2732_s21 = smov 0   ;;  %s2734_s22 = smov 0  }
   0x2   :  { %s2736_s23 = smov 0   ;;  %s2738_s24 = smov 0  }
   0x3   :  { %s2740_s25 = smov 0   ;;  %s2742_s26 = smov 0  }
   0x4 LB: > { %s2024_s27 = sadd.s32 4294967295, %s2687_s26   ;;  %s2025_s28 = sadd.s32 4294967294, %s2687_s26   ;;  %s2687_s26 = sphi %s2742_s26, %s19_s26   ;;  %s2683_s25 = sphi %s2740_s25, %s3746_s25   ;;  %s2679_s24 = sphi %s2738_s24, %s3745_s24   ;;  %s2675_s23 = sphi %s2736_s23, %s3744_s23   ;;  %s2671_s22 = sphi %s2734_s22, %s3743_s22   ;;  %s2667_s21 = sphi %s2732_s21, %s3742_s21  }
   0x5   : > { %s31_s29 = sadd.s32 1, %s2683_s25  ;;  %s171_s30 = sadd.s32 1, %s2675_s23 }
   0x6   : > { %p33_p0 = scmp.ge.s32.totalorder %s31_s29, 2  ;;  %p181_p1 = scmp.ne.s32.totalorder %s2675_s23, %s2671_s22 }
   0x7   : > { %p182_p2 = scmp.eq.s32.totalorder %s2024_s27, 1  ;;  %p187_p3 = scmp.ne.s32.totalorder %s2671_s22, %s2667_s21 }
   0x8   : > { %s3748_s29 = smov (%p33_p0, %s31_s29), 0  ;;  %p188_p5 = scmp.eq.s32.totalorder %s2025_s28, 1 }
   0x9   : > { %p2772_p4 = por %p182_p2, %p181_p1  ;;  %s168_s8 = ssub.s32 %s2683_s25, %s3748_s29 }
   0xa   : > { %p2028_p6 = scmp.ge.s32.totalorder %s2687_s26, 1  ;;  %p169_p7 = scmp.eq.s32.totalorder %s168_s8, 0 }
   0xb   : > { %p2779_p8 = por %p188_p5, %p187_p3  ;;  %p234_p9 = scmp.lt.s32.totalorder %s2687_s26, 3 }
   0xc   : > { %s2785_s10 = scalar_select %p169_p7, %s2675_s23, %s171_s30  }
   0xd   : > { %p235_p10 = pnand %p2028_p6, %p234_p9 }
   0xe   : > { %p269_p11 = scmp.lt.s32.totalorder (!%p235_p10), %s2679_s24, 1  ;;  %s2692_s18 = smov (!%p235_p10), 32  }
   0xf   : > { %238 = sbr.rel (%p235_p10) target bundleno = 1627 (0x65b), region = 44  ;;  %s2693_s19 = smov (!%p235_p10), 64  }
  0x10   : > { %s2694_s20 = smov (!%p235_p10), 96   ;;  %s265_s27 = sand.u32 (!%p235_p10), 1, %s2671_s22  }
  0x11   : > { %s2029_s28 = sshll.u32 (!%p235_p10), %s265_s27, 1  ;;  %s2105_s30 = sshll.u32 (!%p235_p10), %s2679_s24, 5 }
  0x12   : > { %s267_s8 = scalar_lea.vmem (!%p235_p10), [#allocation4], %s2029_s28  ;;  %s1937_s15 = scalar_lea.sflag (!%p235_p10), [#allocation5], %s265_s27 }
  0x13   : > { %s1951_s11 = sshll.u32 (!%p235_p10), %s267_s8, 4  ;;  %s1952_s11 = int_to_ptr.vmem [resolvable:$true] %s1951_s11 }
  0x14   : > { %v318_v0 = vld [vmem:[%s3734_s1] sm:$0xff]  ;;  %s270_s13 = scalar_select %p269_p11, %s2679_s24, 1  ;;  %vm326_vm0 = vcmask 64512   ;;  %vm282_vm1 = vcmask 261120   ;;  %vm284_vm2 = vcmask 57344   ;;  %vm1906_vm3 = vcmask 523264  }
  0x15   : > { %2210 = vmatprep.subr.mxu0 %v318_v0  ;;  %v2864_v33 = vld [vmem:[%s3735_s2] ss:$0 sm:$0xff]  ;;  %vm1908_vm4 = vcmask 785408   ;;  %s2611_s16 = scalar_lea.vmem %s1952_s11, 32 }
  0x16   : > { %2211 = vmatpush3.msra.mxu0 %v318_v0  ;;  %s2104_s14 = sshll.u32 %s270_s13, 8  ;;  %p2612_p12 = scmp.ne.s32.totalorder %s1952_s11, %s2611_s16 }
  0x17   : > { %s2795_s17 = scalar_lea.vmem %s3733_s0, %s2104_s14  ;;  %s1949_s14 = scalar_lea.hbm %s3739_s6, %s2105_s30 }
  0x18   : > { %v286_v1 = vld [vmem:[%s2795_s17] sm:$0xff]  ;;  %v287_v2 = vld [vmem:[%s2795_s17 + $0x8] sm:$0xff]  ;;  %v288_v3 = vld [vmem:[%s2795_s17 + $0x10] sm:$0xff]  ;;  %p2613_p13 = pnand %p2612_p12, %p2772_p4 }
  0x19   : > { %2212 = vmatprep.mubr.msk.f32.mxu0 %vm326_vm0, %v286_v1  ;;  %v289_v4 = vld [vmem:[%s2795_s17 + $0x18] sm:$0xff]  ;;  %v290_v5 = vld [vmem:[%s2795_s17 + $0x20] sm:$0xff]  ;;  %v291_v6 = vld [vmem:[%s2795_s17 + $0x28] sm:$0xff] }
  0x1a   : > { %2213 = vmatmul.mubr.msk.f32.vlgmr.msra.gmra.mxu0 %vm326_vm0, %v287_v2  ;;  %v292_v7 = vld [vmem:[%s2795_s17 + $0x30] sm:$0xff]  ;;  %v293_v8 = vld [vmem:[%s2795_s17 + $0x38] sm:$0xff]  ;;  %v294_v9 = vld [vmem:[%s2795_s17 + $0x40] sm:$0xff]  ;;  %p2614_p0 = pneg %p2613_p13 }
  0x1b   : > { %2215 = vmatprep.mubr.msk.f32.mxu0 %vm326_vm0, %v288_v3  ;;  %v295_v10 = vld [vmem:[%s2795_s17 + $0x48] sm:$0xff]  ;;  %v296_v11 = vld [vmem:[%s2795_s17 + $0x50] sm:$0xff]  ;;  %v297_v12 = vld [vmem:[%s2795_s17 + $0x58] sm:$0xff] }
  0x1c   : > { %v298_v13 = vld [vmem:[%s2795_s17 + $0x60] sm:$0xff]  ;;  %v299_v14 = vld [vmem:[%s2795_s17 + $0x68] sm:$0xff]  ;;  %v300_v15 = vld [vmem:[%s2795_s17 + $0x70] sm:$0xff] }
  0x1d   : > { %v301_v16 = vld [vmem:[%s2795_s17 + $0x78] sm:$0xff]  ;;  %v302_v17 = vld [vmem:[%s2795_s17 + $0x80] sm:$0xff]  ;;  %v303_v18 = vld [vmem:[%s2795_s17 + $0x88] sm:$0xff] }
  0x1e   : > { %2216 = vmatmul.mubr.msk.f32.gmra.mxu0 %vm326_vm0, %v289_v4  ;;  %v304_v19 = vld [vmem:[%s2795_s17 + $0x90] sm:$0xff]  ;;  %v305_v20 = vld [vmem:[%s2795_s17 + $0x98] sm:$0xff]  ;;  %v306_v21 = vld [vmem:[%s2795_s17 + $0xa0] sm:$0xff] }
  0x1f   : > { %2218 = vmatprep.mubr.msk.f32.mxu0 %vm326_vm0, %v290_v5  ;;  %v307_v22 = vld [vmem:[%s2795_s17 + $0xa8] sm:$0xff]  ;;  %v308_v23 = vld [vmem:[%s2795_s17 + $0xb0] sm:$0xff]  ;;  %v309_v24 = vld [vmem:[%s2795_s17 + $0xb8] sm:$0xff] }
  0x20   : > { %v310_v25 = vld [vmem:[%s2795_s17 + $0xc0] sm:$0xff]  ;;  %v311_v26 = vld [vmem:[%s2795_s17 + $0xc8] sm:$0xff]  ;;  %v312_v27 = vld [vmem:[%s2795_s17 + $0xd0] sm:$0xff] }
  0x21   : > { %v313_v28 = vld [vmem:[%s2795_s17 + $0xd8] sm:$0xff]  ;;  %v314_v29 = vld [vmem:[%s2795_s17 + $0xe0] sm:$0xff]  ;;  %v315_v30 = vld [vmem:[%s2795_s17 + $0xe8] sm:$0xff] }
  0x22   : > { %2219 = vmatmul.mubr.msk.f32.gmra.mxu0 %vm326_vm0, %v291_v6  ;;  %v316_v31 = vld [vmem:[%s2795_s17 + $0xf0] sm:$0xff]  ;;  %v317_v32 = vld [vmem:[%s2795_s17 + $0xf8] sm:$0xff]  ;;  %s2696_s17 = smov [#allocation4]  }
  0x23   : > { %2221 = vmatprep.mubr.msk.f32.mxu0 %vm326_vm0, %v292_v7 }
  0x26   : > { %2222 = vmatmul.mubr.msk.f32.gmra.mxu0 %vm326_vm0, %v293_v8 }
  0x27   : > { %2224 = vmatprep.mubr.msk.f32.mxu0 %vm326_vm0, %v294_v9 }
  0x2a   : > { %2225 = vmatmul.mubr.msk.f32.gmra.mxu0 %vm326_vm0, %v295_v10 }
  0x2b   : > { %2227 = vmatprep.mubr.msk.f32.mxu0 %vm326_vm0, %v296_v11 }
  0x2e   : > { %2228 = vmatmul.mubr.msk.f32.gmra.mxu0 %vm326_vm0, %v297_v12 }
  0x2f   : > { %2230 = vmatprep.mubr.msk.f32.mxu0 %vm326_vm0, %v298_v13 }
  0x32   : > { %2231 = vmatmul.mubr.msk.f32.gmra.mxu0 %vm326_vm0, %v299_v14 }
  0x33   : > { %2233 = vmatprep.mubr.msk.f32.mxu0 %vm326_vm0, %v300_v15 }
  0x36   : > { %2234 = vmatmul.mubr.msk.f32.gmra.mxu0 %vm326_vm0, %v301_v16 }
  0x37   : > { %2236 = vmatprep.mubr.msk.f32.mxu0 %vm326_vm0, %v302_v17 }
  0x3a   : > { %2237 = vmatmul.mubr.msk.f32.gmra.mxu0 %vm326_vm0, %v303_v18 }
  0x3b   : > { %2239 = vmatprep.mubr.msk.f32.mxu0 %vm326_vm0, %v304_v19 }
  0x3e   : > { %2240 = vmatmul.mubr.msk.f32.gmra.mxu0 %vm326_vm0, %v305_v20 }
  0x3f   : > { %2242 = vmatprep.mubr.msk.f32.mxu0 %vm326_vm0, %v306_v21 }
  0x42   : > { %2243 = vmatmul.mubr.msk.f32.gmra.mxu0 %vm326_vm0, %v307_v22 }
  0x43   : > { %2245 = vmatprep.mubr.msk.f32.mxu0 %vm326_vm0, %v308_v23 }
  0x46   : > { %2246 = vmatmul.mubr.msk.f32.gmra.mxu0 %vm326_vm0, %v309_v24 }
  0x47   : > { %2248 = vmatprep.mubr.msk.f32.mxu0 %vm326_vm0, %v310_v25 }
  0x4a   : > { %2249 = vmatmul.mubr.msk.f32.gmra.mxu0 %vm326_vm0, %v311_v26 }
  0x4b   : > { %2251 = vmatprep.mubr.msk.f32.mxu0 %vm326_vm0, %v312_v27 }
  0x4e   : > { %2252 = vmatmul.mubr.msk.f32.gmra.mxu0 %vm326_vm0, %v313_v28 }
  0x4f   : > { %2254 = vmatprep.mubr.msk.f32.mxu0 %vm326_vm0, %v314_v29 }
  0x52   : > { %2255 = vmatmul.mubr.msk.f32.gmra.mxu0 %vm326_vm0, %v315_v30 }
  0x53   : > { %2257 = vmatprep.mubr.msk.f32.mxu0 %vm326_vm0, %v316_v31 }
  0x56   : > { %2258 = vmatmul.mubr.msk.f32.gmra.mxu0 %vm326_vm0, %v317_v32 }
  0xda   : > { %v2214_v34 = vpop.f32.mrf.mxu0 }
  0xdb   : > { %v495_v35 = vadd.f32 %v2214_v34, %v2864_v33 }
  0xdc   : > { %v489_v36 = vpop.f32.mrf.mxu0 }
  0xdd   : > { %v490_v37 = vadd.f32 %v2864_v33, %v489_v36  ;;  %v2868_v38 = vmax.f32 %v495_v35, 0.0 }
  0xde   : > { %v2217_v39 = vpop.f32.mrf.mxu0 }
  0xdf   : > { %v2870_v40 = vmax.f32 %v490_v37, 0.0  ;;  %v505_v41 = vadd.f32 %v2217_v39, %v2864_v33  ;;  %v681_v47 = vmul.f32 %v2868_v38, %v2868_v38 }
  0xe0   : > { %v499_v42 = vpop.f32.mrf.mxu0 }
  0xe1   : > { %v500_v43 = vadd.f32 %v2864_v33, %v499_v42  ;;  %v680_v44 = vmul.f32 %v2870_v40, %v2870_v40  ;;  %v2876_v45 = vmax.f32 %v505_v41, 0.0  ;;  %v716_v55 = vsel %vm282_vm1, %v681_v47, 0.0 }
  0xe2   : > { %v2220_v46 = vpop.f32.mrf.mxu0 }
  0xe3   : > { %v2880_v48 = vmax.f32 %v500_v43, 0.0  ;;  %v515_v49 = vadd.f32 %v2220_v46, %v2864_v33  ;;  %v713_v50 = vsel %vm282_vm1, %v680_v44, 0.0  ;;  %v683_v56 = vmul.f32 %v2876_v45, %v2876_v45 }
  0xe4   : > { %v509_v51 = vpop.f32.mrf.mxu0  ;;  %714 = vadd.xlane.f32.xlu0 %v713_v50 }
  0xe5   : > { %v510_v52 = vadd.f32 %v2864_v33, %v509_v51  ;;  %v682_v53 = vmul.f32 %v2880_v48, %v2880_v48  ;;  %v2890_v57 = vmax.f32 %v515_v49, 0.0  ;;  %v722_v2 = vsel %vm282_vm1, %v683_v56, 0.0 }
  0xe6   : > { %v2223_v54 = vpop.f32.mrf.mxu0 }
  0xe7   : > { %v2892_v58 = vmax.f32 %v510_v52, 0.0  ;;  %v525_v59 = vadd.f32 %v2223_v54, %v2864_v33  ;;  %v719_v60 = vsel %vm282_vm1, %v682_v53, 0.0  ;;  %v685_v6 = vmul.f32 %v2890_v57, %v2890_v57  ;;  %v908_v53 = vld [vmem:[%s3736_s3 + $0x18] sm:$0xff] }
  0xe8   : > { %v519_v61 = vpop.f32.mrf.mxu0  ;;  %720 = vadd.xlane.f32.xlu1 %v719_v60  ;;  %717 = vadd.xlane.f32.xlu0 %v716_v55 }
  0xe9   : > { %v520_v62 = vadd.f32 %v2864_v33, %v519_v61  ;;  %v684_v63 = vmul.f32 %v2892_v58, %v2892_v58  ;;  %v2899_v0 = vmax.f32 %v525_v59, 0.0  ;;  %v728_v15 = vsel %vm282_vm1, %v685_v6, 0.0  ;;  %2260 = vmatprep.subr.mxu1 %v908_v53  ;;  %v907_v61 = vld [vmem:[%s3736_s3 + $0x10] sm:$0xff] }
  0xea   : > { %v2226_v1 = vpop.f32.mrf.mxu0  ;;  %2261 = vmatpush3.msra.mxu1 %v908_v53 }
  0xeb   : > { %v2902_v3 = vmax.f32 %v520_v62, 0.0  ;;  %v535_v4 = vadd.f32 %v2226_v1, %v2864_v33  ;;  %v725_v5 = vsel %vm282_vm1, %v684_v63, 0.0  ;;  %v687_v12 = vmul.f32 %v2899_v0, %v2899_v0  ;;  %2262 = vmatprep.subr.mxu1 %v907_v61 }
  0xec   : > { %v529_v7 = vpop.f32.mrf.mxu0  ;;  %723 = vadd.xlane.f32.xlu1 %v722_v2  ;;  %726 = vadd.xlane.f32.xlu0 %v725_v5  ;;  %v906_v5 = vld [vmem:[%s3736_s3 + $0x8] sm:$0xff] }
  0xed   : > { %v530_v8 = vadd.f32 %v2864_v33, %v529_v7  ;;  %v686_v9 = vmul.f32 %v2902_v3, %v2902_v3  ;;  %v2911_v10 = vmax.f32 %v535_v4, 0.0  ;;  %v734_v21 = vsel %vm282_vm1, %v687_v12, 0.0  ;;  %2263 = vmatpush3.msra.mxu1 %v907_v61  ;;  %v905_v12 = vld [vmem:[%s3736_s3] sm:$0xff] }
  0xee   : > { %v2229_v11 = vpop.f32.mrf.mxu0  ;;  %2264 = vmatprep.subr.mxu1 %v906_v5 }
  0xef   : > { %v2915_v13 = vmax.f32 %v530_v8, 0.0  ;;  %v545_v14 = vadd.f32 %v2229_v11, %v2864_v33  ;;  %v731_v16 = vsel %vm282_vm1, %v686_v9, 0.0  ;;  %v689_v22 = vmul.f32 %v2911_v10, %v2911_v10  ;;  %2265 = vmatpush3.msra.mxu1 %v906_v5 }
  0xf0   : > { %v539_v17 = vpop.f32.mrf.mxu0  ;;  %729 = vadd.xlane.f32.xlu1 %v728_v15  ;;  %732 = vadd.xlane.f32.xlu0 %v731_v16 }
  0xf1   : > { %v540_v18 = vadd.f32 %v2864_v33, %v539_v17  ;;  %v688_v19 = vmul.f32 %v2915_v13, %v2915_v13  ;;  %v2926_v23 = vmax.f32 %v545_v14, 0.0  ;;  %v740_v32 = vsel %vm282_vm1, %v689_v22, 0.0  ;;  %2266 = vmatprep.subr.mxu1 %v905_v12 }
  0xf2   : > { %v2232_v20 = vpop.f32.mrf.mxu0  ;;  %2267 = vmatpush3.msra.mxu1 %v905_v12 }
  0xf3   : > { %v2928_v24 = vmax.f32 %v540_v18, 0.0  ;;  %v555_v25 = vadd.f32 %v2232_v20, %v2864_v33  ;;  %v737_v26 = vsel %vm282_vm1, %v688_v19, 0.0  ;;  %v691_v37 = vmul.f32 %v2926_v23, %v2926_v23 }
  0xf4   : > { %v549_v27 = vpop.f32.mrf.mxu0  ;;  %735 = vadd.xlane.f32.xlu1 %v734_v21  ;;  %738 = vadd.xlane.f32.xlu0 %v737_v26 }
  0xf5   : > { %v550_v28 = vadd.f32 %v2864_v33, %v549_v27  ;;  %v690_v29 = vmul.f32 %v2928_v24, %v2928_v24  ;;  %v2935_v30 = vmax.f32 %v555_v25, 0.0  ;;  %v746_v50 = vsel %vm282_vm1, %v691_v37, 0.0 }
  0xf6   : > { %v2235_v31 = vpop.f32.mrf.mxu0 }
  0xf7   : > { %v2938_v34 = vmax.f32 %v550_v28, 0.0  ;;  %v565_v35 = vadd.f32 %v2235_v31, %v2864_v33  ;;  %v743_v36 = vsel %vm282_vm1, %v690_v29, 0.0  ;;  %v693_v46 = vmul.f32 %v2935_v30, %v2935_v30 }
  0xf8   : > { %v559_v39 = vpop.f32.mrf.mxu0  ;;  %741 = vadd.xlane.f32.xlu1 %v740_v32  ;;  %744 = vadd.xlane.f32.xlu0 %v743_v36 }
  0xf9   : > { %v560_v41 = vadd.f32 %v2864_v33, %v559_v39  ;;  %v692_v42 = vmul.f32 %v2938_v34, %v2938_v34  ;;  %v2947_v43 = vmax.f32 %v565_v35, 0.0  ;;  %v752_v59 = vsel %vm282_vm1, %v693_v46, 0.0 }
  0xfa   : > { %v2238_v44 = vpop.f32.mrf.mxu0 }
  0xfb   : > { %v2951_v47 = vmax.f32 %v560_v41, 0.0  ;;  %v575_v49 = vadd.f32 %v2238_v44, %v2864_v33  ;;  %v749_v51 = vsel %vm282_vm1, %v692_v42, 0.0  ;;  %v695_v60 = vmul.f32 %v2947_v43, %v2947_v43 }
  0xfc   : > { %v569_v52 = vpop.f32.mrf.mxu0  ;;  %747 = vadd.xlane.f32.xlu1 %v746_v50  ;;  %750 = vadd.xlane.f32.xlu0 %v749_v51 }
  0xfd   : > { %v570_v54 = vadd.f32 %v2864_v33, %v569_v52  ;;  %v694_v55 = vmul.f32 %v2951_v47, %v2951_v47  ;;  %v2968_v62 = vmax.f32 %v575_v49, 0.0  ;;  %v758_v11 = vsel %vm282_vm1, %v695_v60, 0.0 }
  0xfe   : > { %v2241_v56 = vpop.f32.mrf.mxu0 }
  0xff   : > { %v2970_v63 = vmax.f32 %v570_v54, 0.0  ;;  %v585_v1 = vadd.f32 %v2241_v56, %v2864_v33  ;;  %v755_v2 = vsel %vm282_vm1, %v694_v55, 0.0  ;;  %v697_v17 = vmul.f32 %v2968_v62, %v2968_v62 }
 0x100   : > { %v579_v4 = vpop.f32.mrf.mxu0  ;;  %753 = vadd.xlane.f32.xlu1 %v752_v59  ;;  %756 = vadd.xlane.f32.xlu0 %v755_v2 }
 0x101   : > { %v2977_v6 = vmax.f32 %v585_v1, 0.0  ;;  %v580_v7 = vadd.f32 %v2864_v33, %v579_v4  ;;  %v696_v8 = vmul.f32 %v2970_v63, %v2970_v63  ;;  %v764_v28 = vsel %vm282_vm1, %v697_v17, 0.0 }
 0x102   : > { %v2244_v9 = vpop.f32.mrf.mxu0 }
 0x103   : > { %v2986_v14 = vmax.f32 %v580_v7, 0.0  ;;  %v595_v15 = vadd.f32 %v2244_v9, %v2864_v33  ;;  %v761_v16 = vsel %vm282_vm1, %v696_v8, 0.0  ;;  %v699_v19 = vmul.f32 %v2977_v6, %v2977_v6 }
 0x104   : > { %v589_v18 = vpop.f32.mrf.mxu0  ;;  %759 = vadd.xlane.f32.xlu1 %v758_v11  ;;  %762 = vadd.xlane.f32.xlu0 %v761_v16 }
 0x105   : > { %v2994_v20 = vmax.f32 %v595_v15, 0.0  ;;  %v590_v21 = vadd.f32 %v2864_v33, %v589_v18  ;;  %v698_v22 = vmul.f32 %v2986_v14, %v2986_v14  ;;  %v770_v32 = vsel %vm282_vm1, %v699_v19, 0.0 }
 0x106   : > { %v2247_v25 = vpop.f32.mrf.mxu0 }
 0x107   : > { %v2999_v26 = vmax.f32 %v590_v21, 0.0  ;;  %v605_v27 = vadd.f32 %v2247_v25, %v2864_v33  ;;  %v767_v29 = vsel %vm282_vm1, %v698_v22, 0.0  ;;  %v701_v39 = vmul.f32 %v2994_v20, %v2994_v20 }
 0x108   : > { %v599_v31 = vpop.f32.mrf.mxu0  ;;  %765 = vadd.xlane.f32.xlu1 %v764_v28  ;;  %768 = vadd.xlane.f32.xlu0 %v767_v29 }
 0x109   : > { %v3005_v35 = vmax.f32 %v605_v27, 0.0  ;;  %v600_v36 = vadd.f32 %v2864_v33, %v599_v31  ;;  %v700_v37 = vmul.f32 %v2999_v26, %v2999_v26  ;;  %v776_v53 = vsel %vm282_vm1, %v701_v39, 0.0 }
 0x10a   : > { %v2250_v41 = vpop.f32.mrf.mxu0 }
 0x10b   : > { %v3012_v42 = vmax.f32 %v600_v36, 0.0  ;;  %v615_v44 = vadd.f32 %v2250_v41, %v2864_v33  ;;  %v773_v46 = vsel %vm282_vm1, %v700_v37, 0.0  ;;  %v703_v50 = vmul.f32 %v3005_v35, %v3005_v35 }
 0x10c   : > { %v609_v49 = vpop.f32.mrf.mxu0  ;;  %771 = vadd.xlane.f32.xlu1 %v770_v32  ;;  %774 = vadd.xlane.f32.xlu0 %v773_v46 }
 0x10d   : > { %v3018_v51 = vmax.f32 %v615_v44, 0.0  ;;  %v610_v52 = vadd.f32 %v2864_v33, %v609_v49  ;;  %v702_v54 = vmul.f32 %v3012_v42, %v3012_v42  ;;  %v782_v1 = vsel %vm282_vm1, %v703_v50, 0.0 }
 0x10e   : > { %v2253_v55 = vpop.f32.mrf.mxu0 }
 0x10f   : > { %v3024_v56 = vmax.f32 %v610_v52, 0.0  ;;  %v625_v59 = vadd.f32 %v2253_v55, %v2864_v33  ;;  %v779_v60 = vsel %vm282_vm1, %v702_v54, 0.0  ;;  %v705_v7 = vmul.f32 %v3018_v51, %v3018_v51 }
 0x110   : > { %v619_v61 = vpop.f32.mrf.mxu0  ;;  %777 = vadd.xlane.f32.xlu1 %v776_v53  ;;  %780 = vadd.xlane.f32.xlu0 %v779_v60 }
 0x111   : > { %v3029_v2 = vmax.f32 %v625_v59, 0.0  ;;  %v620_v4 = vadd.f32 %v2864_v33, %v619_v61  ;;  %v704_v5 = vmul.f32 %v3024_v56, %v3024_v56  ;;  %v788_v19 = vsel %vm282_vm1, %v705_v7, 0.0 }
 0x112   : > { %v2256_v8 = vpop.f32.mrf.mxu0 }
 0x113   : > { %v3036_v9 = vmax.f32 %v620_v4, 0.0  ;;  %v635_v11 = vadd.f32 %v2256_v8, %v2864_v33  ;;  %v785_v12 = vsel %vm282_vm1, %v704_v5, 0.0  ;;  %v707_v16 = vmul.f32 %v3029_v2, %v3029_v2 }
 0x114   : > { %v629_v15 = vpop.f32.mrf.mxu0  ;;  %783 = vadd.xlane.f32.xlu1 %v782_v1  ;;  %786 = vadd.xlane.f32.xlu0 %v785_v12 }
 0x115   : > { %v3042_v17 = vmax.f32 %v635_v11, 0.0  ;;  %v630_v18 = vadd.f32 %v2864_v33, %v629_v15  ;;  %v706_v21 = vmul.f32 %v3036_v9, %v3036_v9  ;;  %v794_v31 = vsel %vm282_vm1, %v707_v16, 0.0 }
 0x116   : > { %v2259_v22 = vpop.f32.mrf.mxu0 }
 0x117   : > { %v3048_v25 = vmax.f32 %v630_v18, 0.0  ;;  %v645_v27 = vadd.f32 %v2259_v22, %v2864_v33  ;;  %v791_v28 = vsel %vm282_vm1, %v706_v21, 0.0  ;;  %v709_v39 = vmul.f32 %v3042_v17, %v3042_v17 }
 0x118   : > { %v639_v29 = vpop.f32.mrf.mxu0  ;;  %789 = vadd.xlane.f32.xlu1 %v788_v19  ;;  %792 = vadd.xlane.f32.xlu0 %v791_v28 }
 0x119   : > { %v3053_v32 = vmax.f32 %v645_v27, 0.0  ;;  %v640_v36 = vadd.f32 %v2864_v33, %v639_v29  ;;  %v708_v37 = vmul.f32 %v3048_v25, %v3048_v25  ;;  %v800_v46 = vsel %vm282_vm1, %v709_v39, 0.0 }
 0x11b   : > { %v3060_v41 = vmax.f32 %v640_v36, 0.0  ;;  %v797_v44 = vsel %vm282_vm1, %v708_v37, 0.0  ;;  %v711_v33 = vmul.f32 %v3053_v32, %v3053_v32 }
 0x11c   : > { %795 = vadd.xlane.f32.xlu1 %v794_v31  ;;  %798 = vadd.xlane.f32.xlu0 %v797_v44 }
 0x11d   : > { %v710_v49 = vmul.f32 %v3060_v41, %v3060_v41  ;;  %v806_v52 = vsel %vm282_vm1, %v711_v33, 0.0 }
 0x11f   : > { %v803_v50 = vsel %vm282_vm1, %v710_v49, 0.0 }
 0x120   : > { %801 = vadd.xlane.f32.xlu1 %v800_v46  ;;  %804 = vadd.xlane.f32.xlu0 %v803_v50 }
 0x124   : > { %807 = vadd.xlane.f32.xlu1 %v806_v52 }
 0x16d   : > { %v715_v53 = vpop.xlane.xlu0 %714 }
 0x16e   : > { %v809_v54 = vmax.f32 %v715_v53, 1e-24 }
 0x170   : > { %2415 = vrsqrt.f32 %v809_v54 }
 0x171   : > { %v721_v55 = vpop.xlane.xlu1 %720  ;;  %v718_v59 = vpop.xlane.xlu0 %717 }
 0x172   : > { %v811_v60 = vmax.f32 %v721_v55, 1e-24  ;;  %v810_v61 = vmax.f32 %v718_v59, 1e-24 }
 0x174   : > { %2417 = vrsqrt.f32 %v811_v60 }
 0x175   : > { %2419 = vrsqrt.f32 %v810_v61  ;;  %v724_v1 = vpop.xlane.xlu1 %723  ;;  %v727_v4 = vpop.xlane.xlu0 %726 }
 0x176   : > { %v812_v5 = vmax.f32 %v724_v1, 1e-24  ;;  %v813_v7 = vmax.f32 %v727_v4, 1e-24 }
 0x178   : > { %2421 = vrsqrt.f32 %v812_v5 }
 0x179   : > { %2423 = vrsqrt.f32 %v813_v7  ;;  %v730_v8 = vpop.xlane.xlu1 %729  ;;  %v733_v11 = vpop.xlane.xlu0 %732 }
 0x17a   : > { %v814_v12 = vmax.f32 %v730_v8, 1e-24  ;;  %v815_v15 = vmax.f32 %v733_v11, 1e-24 }
 0x17c   : > { %2425 = vrsqrt.f32 %v814_v12 }
 0x17d   : > { %v2416_v16 = vpop.eup %2415  ;;  %2427 = vrsqrt.f32 %v815_v15  ;;  %v736_v18 = vpop.xlane.xlu1 %735 }
 0x17e   : > { %v739_v19 = vpop.xlane.xlu0 %738  ;;  %v816_v21 = vmax.f32 %v736_v18, 1e-24  ;;  %v3071_v27 = vmul.f32 %v2416_v16, %v2870_v40 }
 0x17f   : > { %v817_v22 = vmax.f32 %v739_v19, 1e-24 }
 0x180   : > { %2429 = vrsqrt.f32 %v816_v21  ;;  %2268 = vmatprep.mubr.msk.f32.mxu1 %vm282_vm1, %v3071_v27 }
 0x181   : > { %v2418_v28 = vpop.eup %2417  ;;  %2431 = vrsqrt.f32 %v817_v22  ;;  %v742_v29 = vpop.xlane.xlu1 %741 }
 0x182   : > { %v745_v31 = vpop.xlane.xlu0 %744  ;;  %v2420_v36 = vpop.eup %2419  ;;  %v818_v37 = vmax.f32 %v742_v29, 1e-24  ;;  %v3076_v44 = vmul.f32 %v2418_v28, %v2880_v48 }
 0x183   : > { %v819_v39 = vmax.f32 %v745_v31, 1e-24  ;;  %v3079_v46 = vmul.f32 %v2420_v36, %v2868_v38 }
 0x184   : > { %2433 = vrsqrt.f32 %v818_v37 }
 0x185   : > { %v2422_v40 = vpop.eup %2421  ;;  %2435 = vrsqrt.f32 %v819_v39  ;;  %2269 = vmatmul.mubr.msk.f32.vlgmr.msra.gmra.mxu1 %vm282_vm1, %v3079_v46  ;;  %v748_v49 = vpop.xlane.xlu1 %747 }
 0x186   : > { %v751_v33 = vpop.xlane.xlu0 %750  ;;  %v2424_v50 = vpop.eup %2423  ;;  %v820_v52 = vmax.f32 %v748_v49, 1e-24  ;;  %2271 = vmatprep.mubr.msk.f32.mxu1 %vm282_vm1, %v3076_v44  ;;  %v3086_v48 = vmul.f32 %v2422_v40, %v2876_v45 }
 0x187   : > { %v821_v53 = vmax.f32 %v751_v33, 1e-24  ;;  %v3089_v38 = vmul.f32 %v2424_v50, %v2892_v58 }
 0x188   : > { %2437 = vrsqrt.f32 %v820_v52 }
 0x189   : > { %v2426_v54 = vpop.eup %2425  ;;  %2439 = vrsqrt.f32 %v821_v53  ;;  %2272 = vmatmul.mubr.msk.f32.gmra.mxu1 %vm282_vm1, %v3086_v48  ;;  %v754_v55 = vpop.xlane.xlu1 %753 }
 0x18a   : > { %v757_v59 = vpop.xlane.xlu0 %756  ;;  %v2428_v60 = vpop.eup %2427  ;;  %v822_v61 = vmax.f32 %v754_v55, 1e-24  ;;  %2274 = vmatprep.mubr.msk.f32.mxu1 %vm282_vm1, %v3089_v38  ;;  %v3096_v45 = vmul.f32 %v2426_v54, %v2890_v57 }
 0x18b   : > { %v823_v1 = vmax.f32 %v757_v59, 1e-24  ;;  %v3099_v58 = vmul.f32 %v2428_v60, %v2902_v3 }
 0x18c   : > { %2441 = vrsqrt.f32 %v822_v61 }
 0x18d   : > { %v2430_v4 = vpop.eup %2429  ;;  %2443 = vrsqrt.f32 %v823_v1  ;;  %2275 = vmatmul.mubr.msk.f32.gmra.mxu1 %vm282_vm1, %v3096_v45  ;;  %v760_v5 = vpop.xlane.xlu1 %759 }
 0x18e   : > { %v763_v7 = vpop.xlane.xlu0 %762  ;;  %v2432_v8 = vpop.eup %2431  ;;  %v824_v11 = vmax.f32 %v760_v5, 1e-24  ;;  %2277 = vmatprep.mubr.msk.f32.mxu1 %vm282_vm1, %v3099_v58  ;;  %v3106_v57 = vmul.f32 %v2430_v4, %v2899_v0 }
 0x18f   : > { %v825_v12 = vmax.f32 %v763_v7, 1e-24  ;;  %v3109_v3 = vmul.f32 %v2432_v8, %v2915_v13 }
 0x190   : > { %2445 = vrsqrt.f32 %v824_v11 }
 0x191   : > { %v2434_v15 = vpop.eup %2433  ;;  %2447 = vrsqrt.f32 %v825_v12  ;;  %2278 = vmatmul.mubr.msk.f32.gmra.mxu1 %vm282_vm1, %v3106_v57  ;;  %v766_v16 = vpop.xlane.xlu1 %765 }
 0x192   : > { %v769_v18 = vpop.xlane.xlu0 %768  ;;  %v2436_v19 = vpop.eup %2435  ;;  %v826_v21 = vmax.f32 %v766_v16, 1e-24  ;;  %2280 = vmatprep.mubr.msk.f32.mxu1 %vm282_vm1, %v3109_v3  ;;  %v3116_v0 = vmul.f32 %v2434_v15, %v2911_v10 }
 0x193   : > { %v827_v22 = vmax.f32 %v769_v18, 1e-24  ;;  %v3119_v13 = vmul.f32 %v2436_v19, %v2928_v24 }
 0x194   : > { %2449 = vrsqrt.f32 %v826_v21 }
 0x195   : > { %v2438_v28 = vpop.eup %2437  ;;  %2451 = vrsqrt.f32 %v827_v22  ;;  %2281 = vmatmul.mubr.msk.f32.gmra.mxu1 %vm282_vm1, %v3116_v0  ;;  %v772_v29 = vpop.xlane.xlu1 %771 }
 0x196   : > { %v775_v31 = vpop.xlane.xlu0 %774  ;;  %v2440_v36 = vpop.eup %2439  ;;  %v828_v37 = vmax.f32 %v772_v29, 1e-24  ;;  %2283 = vmatprep.mubr.msk.f32.mxu1 %vm282_vm1, %v3119_v13  ;;  %v3126_v10 = vmul.f32 %v2438_v28, %v2926_v23 }
 0x197   : > { %v829_v39 = vmax.f32 %v775_v31, 1e-24  ;;  %v3129_v24 = vmul.f32 %v2440_v36, %v2938_v34 }
 0x198   : > { %2453 = vrsqrt.f32 %v828_v37 }
 0x199   : > { %v2442_v40 = vpop.eup %2441  ;;  %2455 = vrsqrt.f32 %v829_v39  ;;  %2284 = vmatmul.mubr.msk.f32.gmra.mxu1 %vm282_vm1, %v3126_v10  ;;  %v778_v49 = vpop.xlane.xlu1 %777 }
 0x19a   : > { %v781_v33 = vpop.xlane.xlu0 %780  ;;  %v2444_v50 = vpop.eup %2443  ;;  %v830_v52 = vmax.f32 %v778_v49, 1e-24  ;;  %2286 = vmatprep.mubr.msk.f32.mxu1 %vm282_vm1, %v3129_v24  ;;  %v3136_v23 = vmul.f32 %v2442_v40, %v2935_v30 }
 0x19b   : > { %v831_v53 = vmax.f32 %v781_v33, 1e-24  ;;  %v3139_v34 = vmul.f32 %v2444_v50, %v2951_v47 }
 0x19c   : > { %2457 = vrsqrt.f32 %v830_v52 }
 0x19d   : > { %v2446_v54 = vpop.eup %2445  ;;  %2459 = vrsqrt.f32 %v831_v53  ;;  %2287 = vmatmul.mubr.msk.f32.gmra.mxu1 %vm282_vm1, %v3136_v23  ;;  %v784_v55 = vpop.xlane.xlu1 %783 }
 0x19e   : > { %v787_v59 = vpop.xlane.xlu0 %786  ;;  %v2448_v60 = vpop.eup %2447  ;;  %v832_v61 = vmax.f32 %v784_v55, 1e-24  ;;  %2289 = vmatprep.mubr.msk.f32.mxu1 %vm282_vm1, %v3139_v34  ;;  %v3146_v30 = vmul.f32 %v2446_v54, %v2947_v43 }
 0x19f   : > { %v833_v1 = vmax.f32 %v787_v59, 1e-24  ;;  %v3149_v47 = vmul.f32 %v2448_v60, %v2970_v63 }
 0x1a0   : > { %2461 = vrsqrt.f32 %v832_v61 }
 0x1a1   : > { %v2450_v4 = vpop.eup %2449  ;;  %2463 = vrsqrt.f32 %v833_v1  ;;  %2290 = vmatmul.mubr.msk.f32.gmra.mxu1 %vm282_vm1, %v3146_v30  ;;  %v790_v5 = vpop.xlane.xlu1 %789 }
 0x1a2   : > { %v793_v7 = vpop.xlane.xlu0 %792  ;;  %v2452_v8 = vpop.eup %2451  ;;  %v834_v11 = vmax.f32 %v790_v5, 1e-24  ;;  %2292 = vmatprep.mubr.msk.f32.mxu1 %vm282_vm1, %v3149_v47  ;;  %v3156_v43 = vmul.f32 %v2450_v4, %v2968_v62 }
 0x1a3   : > { %v835_v12 = vmax.f32 %v793_v7, 1e-24  ;;  %v3159_v63 = vmul.f32 %v2452_v8, %v2986_v14 }
 0x1a4   : > { %2465 = vrsqrt.f32 %v834_v11 }
 0x1a5   : > { %v2454_v15 = vpop.eup %2453  ;;  %2467 = vrsqrt.f32 %v835_v12  ;;  %2293 = vmatmul.mubr.msk.f32.gmra.mxu1 %vm282_vm1, %v3156_v43  ;;  %v796_v16 = vpop.xlane.xlu1 %795 }
 0x1a6   : > { %v799_v18 = vpop.xlane.xlu0 %798  ;;  %v2456_v19 = vpop.eup %2455  ;;  %v836_v21 = vmax.f32 %v796_v16, 1e-24  ;;  %2295 = vmatprep.mubr.msk.f32.mxu1 %vm282_vm1, %v3159_v63  ;;  %v3166_v62 = vmul.f32 %v2454_v15, %v2977_v6 }
 0x1a7   : > { %v837_v22 = vmax.f32 %v799_v18, 1e-24  ;;  %v3169_v14 = vmul.f32 %v2456_v19, %v2999_v26 }
 0x1a8   : > { %2469 = vrsqrt.f32 %v836_v21 }
 0x1a9   : > { %v2458_v28 = vpop.eup %2457  ;;  %2471 = vrsqrt.f32 %v837_v22  ;;  %2296 = vmatmul.mubr.msk.f32.gmra.mxu1 %vm282_vm1, %v3166_v62  ;;  %v802_v29 = vpop.xlane.xlu1 %801 }
 0x1aa   : > { %v805_v31 = vpop.xlane.xlu0 %804  ;;  %v2460_v36 = vpop.eup %2459  ;;  %v838_v37 = vmax.f32 %v802_v29, 1e-24  ;;  %2298 = vmatprep.mubr.msk.f32.mxu1 %vm282_vm1, %v3169_v14  ;;  %v894_v6 = vmul.f32 %v2458_v28, %v2994_v20 }
 0x1ab   : > { %v839_v39 = vmax.f32 %v805_v31, 1e-24  ;;  %v895_v40 = vmul.f32 %v2460_v36, %v3012_v42 }
 0x1ac   : > { %2473 = vrsqrt.f32 %v838_v37 }
 0x1ad   : > { %v2462_v26 = vpop.eup %2461  ;;  %2475 = vrsqrt.f32 %v839_v39  ;;  %2299 = vmatmul.mubr.msk.f32.gmra.mxu1 %vm282_vm1, %v894_v6  ;;  %v808_v49 = vpop.xlane.xlu1 %807 }
 0x1ae   : > { %v2464_v33 = vpop.eup %2463  ;;  %v840_v50 = vmax.f32 %v808_v49, 1e-24  ;;  %2301 = vmatprep.mubr.msk.f32.mxu1 %vm282_vm1, %v895_v40  ;;  %v896_v52 = vmul.f32 %v2462_v26, %v3005_v35 }
 0x1af   : > { %v897_v53 = vmul.f32 %v2464_v33, %v3024_v56 }
 0x1b0   : > { %2477 = vrsqrt.f32 %v840_v50 }
 0x1b1   : > { %v2466_v54 = vpop.eup %2465  ;;  %2302 = vmatmul.mubr.msk.f32.gmra.mxu1 %vm282_vm1, %v896_v52 }
 0x1b2   : > { %v2468_v20 = vpop.eup %2467  ;;  %2304 = vmatprep.mubr.msk.f32.mxu1 %vm282_vm1, %v897_v53  ;;  %v898_v42 = vmul.f32 %v2466_v54, %v3018_v51 }
 0x1b3   : > { %v899_v55 = vmul.f32 %v2468_v20, %v3036_v9 }
 0x1b5   : > { %v2470_v59 = vpop.eup %2469  ;;  %2305 = vmatmul.mubr.msk.f32.gmra.mxu1 %vm282_vm1, %v898_v42 }
 0x1b6   : > { %v2472_v60 = vpop.eup %2471  ;;  %2307 = vmatprep.mubr.msk.f32.mxu1 %vm282_vm1, %v899_v55  ;;  %v900_v35 = vmul.f32 %v2470_v59, %v3029_v2  ;;  %v3221_v2 = vld [vmem:[%s3737_s4] ss:$0 sm:$0xff] }
 0x1b7   : > { %v901_v56 = vmul.f32 %v2472_v60, %v3048_v25 }
 0x1b9   : > { %v2474_v61 = vpop.eup %2473  ;;  %2308 = vmatmul.mubr.msk.f32.gmra.mxu1 %vm282_vm1, %v900_v35 }
 0x1ba   : > { %v2476_v1 = vpop.eup %2475  ;;  %2310 = vmatprep.mubr.msk.f32.mxu1 %vm282_vm1, %v901_v56  ;;  %v902_v51 = vmul.f32 %v2474_v61, %v3042_v17 }
 0x1bb   : > { %v903_v9 = vmul.f32 %v2476_v1, %v3060_v41 }
 0x1bd   : > { %v2478_v4 = vpop.eup %2477  ;;  %2311 = vmatmul.mubr.msk.f32.gmra.mxu1 %vm282_vm1, %v902_v51 }
 0x1be   : > { %2313 = vmatprep.mubr.msk.f32.mxu1 %vm282_vm1, %v903_v9  ;;  %v904_v5 = vmul.f32 %v2478_v4, %v3053_v32 }
 0x1c0   : > { %2175 = vmatprep.subr.mxu0 %v904_v5 }
 0x1c1   : > { %2314 = vmatmul.mubr.msk.f32.gmra.mxu1 %vm282_vm1, %v904_v5  ;;  %2176 = vmatpush3.msra.mxu0 %v3146_v30 }
 0x1c2   : > { %2177 = vmatprep.subr.mxu0 %v903_v9 }
 0x1c3   : > { %2178 = vmatpush3.msra.mxu0 %v3139_v34 }
 0x1c4   : > { %2179 = vmatprep.subr.mxu0 %v902_v51 }
 0x1c5   : > { %2180 = vmatpush3.msra.mxu0 %v3136_v23 }
 0x1c6   : > { %2181 = vmatprep.subr.mxu0 %v901_v56 }
 0x1c7   : > { %2182 = vmatpush3.msra.mxu0 %v3129_v24 }
 0x1c8   : > { %2183 = vmatprep.subr.mxu0 %v900_v35 }
 0x1c9   : > { %2184 = vmatpush3.msra.mxu0 %v3126_v10 }
 0x1ca   : > { %2185 = vmatprep.subr.mxu0 %v899_v55 }
 0x1cb   : > { %2186 = vmatpush3.msra.mxu0 %v3119_v13 }
 0x1cc   : > { %2187 = vmatprep.subr.mxu0 %v898_v42 }
 0x1cd   : > { %2188 = vmatpush3.msra.mxu0 %v3116_v0 }
 0x1ce   : > { %2189 = vmatprep.subr.mxu0 %v897_v53 }
 0x1cf   : > { %2190 = vmatpush3.msra.mxu0 %v3109_v3 }
 0x1d0   : > { %2191 = vmatprep.subr.mxu0 %v896_v52 }
 0x1d1   : > { %2192 = vmatpush3.msra.mxu0 %v3106_v57 }
 0x1d2   : > { %2193 = vmatprep.subr.mxu0 %v895_v40 }
 0x1d3   : > { %2194 = vmatpush3.msra.mxu0 %v3099_v58 }
 0x1d4   : > { %2195 = vmatprep.subr.mxu0 %v894_v6 }
 0x1d5   : > { %2196 = vmatpush3.msra.mxu0 %v3096_v45 }
 0x1d6   : > { %2197 = vmatprep.subr.mxu0 %v3169_v14 }
 0x1d7   : > { %2198 = vmatpush3.msra.mxu0 %v3089_v38 }
 0x1d8   : > { %2199 = vmatprep.subr.mxu0 %v3166_v62 }
 0x1d9   : > { %2200 = vmatpush3.msra.mxu0 %v3086_v48 }
 0x1da   : > { %2201 = vmatprep.subr.mxu0 %v3159_v63 }
 0x1db   : > { %2202 = vmatpush3.msra.mxu0 %v3076_v44 }
 0x1dc   : > { %2203 = vmatprep.subr.mxu0 %v3156_v43 }
 0x1dd   : > { %2204 = vmatpush3.msra.mxu0 %v3079_v46 }
 0x1de   : > { %2205 = vmatprep.subr.mxu0 %v3149_v47 }
 0x1df   : > { %2206 = vmatpush3.msra.mxu0 %v3071_v27 }
 0x245   : > { %v2270_v17 = vpop.f32.mrf.mxu1 }
 0x246   : > { %v3224_v25 = vadd.f32 %v2270_v17, %v3221_v2 }
 0x247   : > { %v1078_v32 = vpop.f32.mrf.mxu1 }
 0x248   : > { %v3227_v41 = vadd.f32 %v3221_v2, %v1078_v32  ;;  %v1240_v44 = vsel %vm326_vm0, %v3224_v25, -inf }
 0x249   : > { %1241 = vmax.xlane.f32.xlu1 %v1240_v44  ;;  %v2273_v46 = vpop.f32.mrf.mxu1 }
 0x24a   : > { %v3232_v27 = vadd.f32 %v2273_v46, %v3221_v2  ;;  %v1237_v38 = vsel %vm326_vm0, %v3227_v41, -inf }
 0x24b   : > { %v1088_v48 = vpop.f32.mrf.mxu1 }
 0x24c   : > { %v3237_v57 = vadd.f32 %v3221_v2, %v1088_v48  ;;  %v1246_v3 = vsel %vm326_vm0, %v3232_v27, -inf }
 0x24d   : > { %1238 = vmax.xlane.f32.xlu1 %v1237_v38  ;;  %v2276_v45 = vpop.f32.mrf.mxu1 }
 0x24e   : > { %v3242_v10 = vadd.f32 %v2276_v45, %v3221_v2  ;;  %v1243_v24 = vsel %vm326_vm0, %v3237_v57, -inf }
 0x24f   : > { %v1098_v58 = vpop.f32.mrf.mxu1 }
 0x250   : > { %v3247_v30 = vadd.f32 %v3221_v2, %v1098_v58  ;;  %v1252_v47 = vsel %vm326_vm0, %v3242_v10, -inf }
 0x251   : > { %1247 = vmax.xlane.f32.xlu1 %v1246_v3  ;;  %v2279_v0 = vpop.f32.mrf.mxu1 }
 0x252   : > { %v3252_v11 = vadd.f32 %v2279_v0, %v3221_v2  ;;  %v1249_v12 = vsel %vm326_vm0, %v3247_v30, -inf }
 0x253   : > { %v1108_v13 = vpop.f32.mrf.mxu1 }
 0x254   : > { %v3257_v15 = vadd.f32 %v3221_v2, %v1108_v13  ;;  %v1258_v16 = vsel %vm326_vm0, %v3252_v11, -inf }
 0x255   : > { %1244 = vmax.xlane.f32.xlu1 %v1243_v24  ;;  %v2282_v23 = vpop.f32.mrf.mxu1 }
 0x256   : > { %v3262_v21 = vadd.f32 %v2282_v23, %v3221_v2  ;;  %v1255_v22 = vsel %vm326_vm0, %v3257_v15, -inf }
 0x257   : > { %v1118_v34 = vpop.f32.mrf.mxu1 }
 0x258   : > { %v3270_v29 = vadd.f32 %v3221_v2, %v1118_v34  ;;  %v1264_v36 = vsel %vm326_vm0, %v3262_v21, -inf }
 0x259   : > { %1253 = vmax.xlane.f32.xlu1 %v1252_v47  ;;  %v2285_v7 = vpop.f32.mrf.mxu1 }
 0x25a   : > { %v3280_v40 = vadd.f32 %v2285_v7, %v3221_v2  ;;  %v1261_v49 = vsel %vm326_vm0, %v3270_v29, -inf }
 0x25b   : > { %v1128_v8 = vpop.f32.mrf.mxu1 }
 0x25c   : > { %v3290_v52 = vadd.f32 %v3221_v2, %v1128_v8  ;;  %v1270_v54 = vsel %vm326_vm0, %v3280_v40, -inf }
 0x25d   : > { %1250 = vmax.xlane.f32.xlu1 %v1249_v12  ;;  %v2288_v43 = vpop.f32.mrf.mxu1 }
 0x25e   : > { %v3300_v55 = vadd.f32 %v2288_v43, %v3221_v2  ;;  %v1267_v60 = vsel %vm326_vm0, %v3290_v52, -inf }
 0x25f   : > { %v1138_v63 = vpop.f32.mrf.mxu1 }
 0x260   : > { %v3310_v61 = vadd.f32 %v3221_v2, %v1138_v63  ;;  %v1276_v51 = vsel %vm326_vm0, %v3300_v55, -inf }
 0x261   : > { %1259 = vmax.xlane.f32.xlu1 %v1258_v16  ;;  %v2291_v18 = vpop.f32.mrf.mxu1 }
 0x262   : > { %v1273_v32 = vsel %vm326_vm0, %v3310_v61, -inf  ;;  %v3330_v48 = vadd.f32 %v2291_v18, %v3221_v2 }
 0x263   : > { %v1148_v19 = vpop.f32.mrf.mxu1 }
 0x264   : > { %v3320_v5 = vadd.f32 %v3221_v2, %v1148_v19  ;;  %v1282_v13 = vsel %vm326_vm0, %v3330_v48, -inf }
 0x265   : > { %1256 = vmax.xlane.f32.xlu1 %v1255_v22  ;;  %v2294_v62 = vpop.f32.mrf.mxu1 }
 0x266   : > { %v3267_v14 = vadd.f32 %v2294_v62, %v3221_v2  ;;  %v1279_v45 = vsel %vm326_vm0, %v3320_v5, -inf }
 0x267   : > { %v1158_v28 = vpop.f32.mrf.mxu1 }
 0x268   : > { %v3273_v31 = vadd.f32 %v3221_v2, %v1158_v28  ;;  %v1288_v37 = vsel %vm326_vm0, %v3267_v14, -inf }
 0x269   : > { %1265 = vmax.xlane.f32.xlu1 %v1264_v36  ;;  %1289 = vmax.xlane.f32.xlu0 %v1288_v37  ;;  %v2297_v39 = vpop.f32.mrf.mxu1 }
 0x26a   : > { %v3283_v26 = vadd.f32 %v2297_v39, %v3221_v2  ;;  %v1285_v33 = vsel %vm326_vm0, %v3273_v31, -inf }
 0x26b   : > { %v1168_v6 = vpop.f32.mrf.mxu1 }
 0x26c   : > { %v3293_v53 = vadd.f32 %v3221_v2, %v1168_v6  ;;  %v1294_v20 = vsel %vm326_vm0, %v3283_v26, -inf }
 0x26d   : > { %1262 = vmax.xlane.f32.xlu1 %v1261_v49  ;;  %1286 = vmax.xlane.f32.xlu0 %v1285_v33  ;;  %v2300_v50 = vpop.f32.mrf.mxu1 }
 0x26e   : > { %v3303_v59 = vadd.f32 %v2300_v50, %v3221_v2  ;;  %v1291_v35 = vsel %vm326_vm0, %v3293_v53, -inf }
 0x26f   : > { %v1178_v42 = vpop.f32.mrf.mxu1 }
 0x270   : > { %v3313_v1 = vadd.f32 %v3221_v2, %v1178_v42  ;;  %v1300_v9 = vsel %vm326_vm0, %v3303_v59, -inf }
 0x271   : > { %1271 = vmax.xlane.f32.xlu1 %v1270_v54  ;;  %1295 = vmax.xlane.f32.xlu0 %v1294_v20  ;;  %v2303_v56 = vpop.f32.mrf.mxu1 }
 0x272   : > { %v3323_v17 = vadd.f32 %v2303_v56, %v3221_v2  ;;  %v1297_v44 = vsel %vm326_vm0, %v3313_v1, -inf }
 0x273   : > { %v1188_v4 = vpop.f32.mrf.mxu1 }
 0x274   : > { %v3333_v38 = vadd.f32 %v3221_v2, %v1188_v4  ;;  %v1306_v58 = vsel %vm326_vm0, %v3323_v17, -inf }
 0x275   : > { %1268 = vmax.xlane.f32.xlu1 %v1267_v60  ;;  %1292 = vmax.xlane.f32.xlu0 %v1291_v35  ;;  %v2306_v46 = vpop.f32.mrf.mxu1 }
 0x276   : > { %v3340_v0 = vadd.f32 %v2306_v46, %v3221_v2  ;;  %v1303_v24 = vsel %vm326_vm0, %v3333_v38, -inf }
 0x277   : > { %v1198_v3 = vpop.f32.mrf.mxu1 }
 0x278   : > { %v3347_v34 = vadd.f32 %v3221_v2, %v1198_v3  ;;  %v1312_v47 = vsel %vm326_vm0, %v3340_v0, -inf }
 0x279   : > { %1277 = vmax.xlane.f32.xlu1 %v1276_v51  ;;  %1301 = vmax.xlane.f32.xlu0 %v1300_v9  ;;  %v2309_v23 = vpop.f32.mrf.mxu1 }
 0x27a   : > { %v3352_v8 = vadd.f32 %v2309_v23, %v3221_v2  ;;  %v1309_v12 = vsel %vm326_vm0, %v3347_v34, -inf }
 0x27b   : > { %v1208_v7 = vpop.f32.mrf.mxu1 }
 0x27c   : > { %v3357_v63 = vadd.f32 %v3221_v2, %v1208_v7  ;;  %v1318_v16 = vsel %vm326_vm0, %v3352_v8, -inf }
 0x27d   : > { %1274 = vmax.xlane.f32.xlu1 %v1273_v32  ;;  %1298 = vmax.xlane.f32.xlu0 %v1297_v44  ;;  %v2312_v43 = vpop.f32.mrf.mxu1 }
 0x27e   : > { %v3362_v19 = vadd.f32 %v2312_v43, %v3221_v2  ;;  %v1315_v22 = vsel %vm326_vm0, %v3357_v63, -inf }
 0x27f   : > { %v1218_v18 = vpop.f32.mrf.mxu1 }
 0x280   : > { %v3367_v28 = vadd.f32 %v3221_v2, %v1218_v18  ;;  %v1324_v36 = vsel %vm326_vm0, %v3362_v19, -inf }
 0x281   : > { %1280 = vmax.xlane.f32.xlu1 %v1279_v45  ;;  %1307 = vmax.xlane.f32.xlu0 %v1306_v58  ;;  %v2315_v62 = vpop.f32.mrf.mxu1 }
 0x282   : > { %v1321_v6 = vsel %vm326_vm0, %v3367_v28, -inf  ;;  %v3377_v49 = vadd.f32 %v2315_v62, %v3221_v2 }
 0x283   : > { %v1228_v37 = vpop.f32.mrf.mxu1 }
 0x284   : > { %v3372_v39 = vadd.f32 %v3221_v2, %v1228_v37  ;;  %v1330_v50 = vsel %vm326_vm0, %v3377_v49, -inf }
 0x285   : > { %1283 = vmax.xlane.f32.xlu1 %v1282_v13  ;;  %1304 = vmax.xlane.f32.xlu0 %v1303_v24 }
 0x286   : > { %v1327_v33 = vsel %vm326_vm0, %v3372_v39, -inf }
 0x289   : > { %1313 = vmax.xlane.f32.xlu0 %v1312_v47 }
 0x28d   : > { %1310 = vmax.xlane.f32.xlu0 %v1309_v12 }
 0x291   : > { %1319 = vmax.xlane.f32.xlu0 %v1318_v16 }
 0x295   : > { %1316 = vmax.xlane.f32.xlu0 %v1315_v22 }
 0x299   : > { %1325 = vmax.xlane.f32.xlu0 %v1324_v36 }
 0x29d   : > { %1322 = vmax.xlane.f32.xlu0 %v1321_v6 }
 0x2a1   : > { %1328 = vmax.xlane.f32.xlu0 %v1327_v33 }
 0x2a5   : > { %1331 = vmax.xlane.f32.xlu0 %v1330_v50 }
 0x2d2   : > { %v1242_v54 = vpop.xlane.xlu1 %1241 }
 0x2d3   : > { %v1334_v20 = vsub.f32 %v3224_v25, %v1242_v54 }
 0x2d5   : > { %v1367_v42 = vmul.f32 1.442695, %v1334_v20 }
 0x2d6   : > { %v1239_v60 = vpop.xlane.xlu1 %1238 }
 0x2d7   : > { %2479 = vpow2.f32 %v1367_v42  ;;  %v1333_v35 = vsub.f32 %v3227_v41, %v1239_v60 }
 0x2d9   : > { %v1365_v56 = vmul.f32 1.442695, %v1333_v35 }
 0x2da   : > { %v1248_v51 = vpop.xlane.xlu1 %1247 }
 0x2db   : > { %2481 = vpow2.f32 %v1365_v56  ;;  %v1336_v2 = vsub.f32 %v3232_v27, %v1248_v51 }
 0x2dd   : > { %v1371_v9 = vmul.f32 1.442695, %v1336_v2 }
 0x2de   : > { %v1245_v4 = vpop.xlane.xlu1 %1244 }
 0x2df   : > { %2483 = vpow2.f32 %v1371_v9  ;;  %v1335_v32 = vsub.f32 %v3237_v57, %v1245_v4 }
 0x2e1   : > { %v1369_v44 = vmul.f32 1.442695, %v1335_v32 }
 0x2e2   : > { %v1254_v46 = vpop.xlane.xlu1 %1253 }
 0x2e3   : > { %2485 = vpow2.f32 %v1369_v44  ;;  %v1338_v25 = vsub.f32 %v3242_v10, %v1254_v46 }
 0x2e4   : > { %v3388_v45 = vpop.eup %2479 }
 0x2e5   : > { %v1375_v58 = vmul.f32 1.442695, %v1338_v25  ;;  %v1432_v41 = vsel %vm326_vm0, %v3388_v45, 0.0 }
 0x2e6   : > { %v1251_v3 = vpop.xlane.xlu1 %1250  ;;  %1433 = vadd.xlane.f32.xlu1 %v1432_v41 }
 0x2e7   : > { %2487 = vpow2.f32 %v1375_v58  ;;  %v1337_v27 = vsub.f32 %v3247_v30, %v1251_v3 }
 0x2e8   : > { %v3393_v13 = vpop.eup %2481 }
 0x2e9   : > { %v1373_v24 = vmul.f32 1.442695, %v1337_v27  ;;  %v1429_v57 = vsel %vm326_vm0, %v3393_v13, 0.0 }
 0x2ea   : > { %v1260_v23 = vpop.xlane.xlu1 %1259  ;;  %1430 = vadd.xlane.f32.xlu1 %v1429_v57 }
 0x2eb   : > { %2489 = vpow2.f32 %v1373_v24  ;;  %v1340_v10 = vsub.f32 %v3252_v11, %v1260_v23 }
 0x2ec   : > { %v3398_v47 = vpop.eup %2483 }
 0x2ed   : > { %v1379_v7 = vmul.f32 1.442695, %v1340_v10  ;;  %v1438_v12 = vsel %vm326_vm0, %v3398_v47, 0.0 }
 0x2ee   : > { %v1257_v43 = vpop.xlane.xlu1 %1256  ;;  %1439 = vadd.xlane.f32.xlu1 %v1438_v12 }
 0x2ef   : > { %2491 = vpow2.f32 %v1379_v7  ;;  %v1339_v30 = vsub.f32 %v3257_v15, %v1257_v43 }
 0x2f0   : > { %v3403_v16 = vpop.eup %2485 }
 0x2f1   : > { %v1377_v18 = vmul.f32 1.442695, %v1339_v30  ;;  %v1435_v22 = vsel %vm326_vm0, %v3403_v16, 0.0 }
 0x2f2   : > { %v1266_v62 = vpop.xlane.xlu1 %1265  ;;  %1436 = vadd.xlane.f32.xlu1 %v1435_v22  ;;  %v1290_v11 = vpop.xlane.xlu0 %1289 }
 0x2f3   : > { %2493 = vpow2.f32 %v1377_v18  ;;  %v1342_v36 = vsub.f32 %v3262_v21, %v1266_v62  ;;  %v1350_v37 = vsub.f32 %v3267_v14, %v1290_v11 }
 0x2f4   : > { %v3409_v6 = vpop.eup %2487 }
 0x2f5   : > { %v1383_v33 = vmul.f32 1.442695, %v1342_v36  ;;  %v1399_v50 = vmul.f32 1.442695, %v1350_v37  ;;  %v1444_v15 = vsel %vm326_vm0, %v3409_v6, 0.0 }
 0x2f6   : > { %v1263_v54 = vpop.xlane.xlu1 %1262  ;;  %1445 = vadd.xlane.f32.xlu1 %v1444_v15  ;;  %v1287_v20 = vpop.xlane.xlu0 %1286 }
 0x2f7   : > { %2495 = vpow2.f32 %v1383_v33  ;;  %v1341_v42 = vsub.f32 %v3270_v29, %v1263_v54  ;;  %v1349_v60 = vsub.f32 %v3273_v31, %v1287_v20 }
 0x2f8   : > { %v3415_v35 = vpop.eup %2489  ;;  %2497 = vpow2.f32 %v1399_v50 }
 0x2f9   : > { %v1381_v21 = vmul.f32 1.442695, %v1341_v42  ;;  %v1397_v14 = vmul.f32 1.442695, %v1349_v60  ;;  %v1441_v56 = vsel %vm326_vm0, %v3415_v35, 0.0 }
 0x2fa   : > { %v1272_v51 = vpop.xlane.xlu1 %1271  ;;  %1442 = vadd.xlane.f32.xlu1 %v1441_v56  ;;  %v1296_v2 = vpop.xlane.xlu0 %1295 }
 0x2fb   : > { %2499 = vpow2.f32 %v1381_v21  ;;  %v1344_v9 = vsub.f32 %v3280_v40, %v1272_v51  ;;  %v1352_v4 = vsub.f32 %v3283_v26, %v1296_v2 }
 0x2fc   : > { %v3421_v32 = vpop.eup %2491  ;;  %2501 = vpow2.f32 %v1397_v14 }
 0x2fd   : > { %v1387_v29 = vmul.f32 1.442695, %v1344_v9  ;;  %v1403_v31 = vmul.f32 1.442695, %v1352_v4  ;;  %v1450_v44 = vsel %vm326_vm0, %v3421_v32, 0.0 }
 0x2fe   : > { %v1269_v46 = vpop.xlane.xlu1 %1268  ;;  %1451 = vadd.xlane.f32.xlu1 %v1450_v44  ;;  %v1293_v25 = vpop.xlane.xlu0 %1292 }
 0x2ff   : > { %2503 = vpow2.f32 %v1387_v29  ;;  %v1343_v58 = vsub.f32 %v3290_v52, %v1269_v46  ;;  %v1351_v41 = vsub.f32 %v3293_v53, %v1293_v25 }
 0x300   : > { %v3427_v3 = vpop.eup %2493  ;;  %2505 = vpow2.f32 %v1403_v31 }
 0x301   : > { %v1385_v40 = vmul.f32 1.442695, %v1343_v58  ;;  %v1401_v26 = vmul.f32 1.442695, %v1351_v41  ;;  %v1447_v27 = vsel %vm326_vm0, %v3427_v3, 0.0 }
 0x302   : > { %v1278_v24 = vpop.xlane.xlu1 %1277  ;;  %1448 = vadd.xlane.f32.xlu1 %v1447_v27  ;;  %v1302_v57 = vpop.xlane.xlu0 %1301 }
 0x303   : > { %2507 = vpow2.f32 %v1385_v40  ;;  %v1346_v23 = vsub.f32 %v3300_v55, %v1278_v24  ;;  %v1354_v10 = vsub.f32 %v3303_v59, %v1302_v57 }
 0x304   : > { %v3433_v7 = vpop.eup %2495  ;;  %2509 = vpow2.f32 %v1401_v26 }
 0x305   : > { %v3435_v52 = vpop.eup %2497  ;;  %v1391_v53 = vmul.f32 1.442695, %v1346_v23  ;;  %v1407_v12 = vmul.f32 1.442695, %v1354_v10  ;;  %v1456_v43 = vsel %vm326_vm0, %v3433_v7, 0.0 }
 0x306   : > { %v1275_v30 = vpop.xlane.xlu1 %1274  ;;  %1457 = vadd.xlane.f32.xlu1 %v1456_v43  ;;  %v1480_v18 = vsel %vm326_vm0, %v3435_v52, 0.0  ;;  %v1299_v22 = vpop.xlane.xlu0 %1298 }
 0x307   : > { %2511 = vpow2.f32 %v1391_v53  ;;  %v1345_v55 = vsub.f32 %v3310_v61, %v1275_v30  ;;  %1481 = vadd.xlane.f32.xlu0 %v1480_v18  ;;  %v1353_v59 = vsub.f32 %v3313_v1, %v1299_v22 }
 0x308   : > { %v3443_v62 = vpop.eup %2499  ;;  %2513 = vpow2.f32 %v1407_v12 }
 0x309   : > { %v3445_v11 = vpop.eup %2501  ;;  %v1389_v36 = vmul.f32 1.442695, %v1345_v55  ;;  %v1405_v37 = vmul.f32 1.442695, %v1353_v59  ;;  %v1453_v33 = vsel %vm326_vm0, %v3443_v62, 0.0 }
 0x30a   : > { %1454 = vadd.xlane.f32.xlu1 %v1453_v33  ;;  %v1281_v50 = vpop.xlane.xlu1 %1280  ;;  %v1477_v15 = vsel %vm326_vm0, %v3445_v11, 0.0  ;;  %v1308_v54 = vpop.xlane.xlu0 %1307 }
 0x30b   : > { %2515 = vpow2.f32 %v1389_v36  ;;  %v1347_v61 = vsub.f32 %v3320_v5, %v1281_v50  ;;  %1478 = vadd.xlane.f32.xlu0 %v1477_v15  ;;  %v1356_v1 = vsub.f32 %v3323_v17, %v1308_v54 }
 0x30c   : > { %v3453_v20 = vpop.eup %2503  ;;  %2517 = vpow2.f32 %v1405_v37 }
 0x30d   : > { %v3455_v42 = vpop.eup %2505  ;;  %v1393_v60 = vmul.f32 1.442695, %v1347_v61  ;;  %v1411_v21 = vmul.f32 1.442695, %v1356_v1  ;;  %v1462_v14 = vsel %vm326_vm0, %v3453_v20, 0.0 }
 0x30e   : > { %1463 = vadd.xlane.f32.xlu1 %v1462_v14  ;;  %v1284_v56 = vpop.xlane.xlu1 %1283  ;;  %v1486_v51 = vsel %vm326_vm0, %v3455_v42, 0.0  ;;  %v1305_v2 = vpop.xlane.xlu0 %1304 }
 0x30f   : > { %2519 = vpow2.f32 %v1393_v60  ;;  %v1348_v5 = vsub.f32 %v3330_v48, %v1284_v56  ;;  %1487 = vadd.xlane.f32.xlu0 %v1486_v51  ;;  %v1355_v17 = vsub.f32 %v3333_v38, %v1305_v2 }
 0x310   : > { %v3463_v9 = vpop.eup %2507  ;;  %2521 = vpow2.f32 %v1411_v21 }
 0x311   : > { %v3465_v4 = vpop.eup %2509  ;;  %v1395_v29 = vmul.f32 1.442695, %v1348_v5  ;;  %v1409_v31 = vmul.f32 1.442695, %v1355_v17  ;;  %v1459_v44 = vsel %vm326_vm0, %v3463_v9, 0.0 }
 0x312   : > { %1460 = vadd.xlane.f32.xlu1 %v1459_v44  ;;  %v1483_v46 = vsel %vm326_vm0, %v3465_v4, 0.0  ;;  %v1314_v25 = vpop.xlane.xlu0 %1313 }
 0x313   : > { %2523 = vpow2.f32 %v1395_v29  ;;  %1484 = vadd.xlane.f32.xlu0 %v1483_v46  ;;  %v1358_v48 = vsub.f32 %v3340_v0, %v1314_v25 }
 0x314   : > { %v3472_v38 = vpop.eup %2511  ;;  %2525 = vpow2.f32 %v1409_v31 }
 0x315   : > { %v3474_v58 = vpop.eup %2513  ;;  %v1415_v41 = vmul.f32 1.442695, %v1358_v48  ;;  %v1468_v40 = vsel %vm326_vm0, %v3472_v38, 0.0 }
 0x316   : > { %1469 = vadd.xlane.f32.xlu1 %v1468_v40  ;;  %v1492_v26 = vsel %vm326_vm0, %v3474_v58, 0.0  ;;  %v1311_v27 = vpop.xlane.xlu0 %1310 }
 0x317   : > { %2527 = vpow2.f32 %v1415_v41  ;;  %1493 = vadd.xlane.f32.xlu0 %v1492_v26  ;;  %v1357_v24 = vsub.f32 %v3347_v34, %v1311_v27 }
 0x318   : > { %v3481_v57 = vpop.eup %2515 }
 0x319   : > { %v3483_v0 = vpop.eup %2517  ;;  %v1413_v23 = vmul.f32 1.442695, %v1357_v24  ;;  %v1465_v10 = vsel %vm326_vm0, %v3481_v57, 0.0 }
 0x31a   : > { %1466 = vadd.xlane.f32.xlu1 %v1465_v10  ;;  %v1489_v53 = vsel %vm326_vm0, %v3483_v0, 0.0  ;;  %v1320_v12 = vpop.xlane.xlu0 %1319  ;;  %v2689_v10 = vmov 0.0  }
 0x31b   : > { %2529 = vpow2.f32 %v1413_v23  ;;  %1490 = vadd.xlane.f32.xlu0 %v1489_v53  ;;  %v1360_v43 = vsub.f32 %v3352_v8, %v1320_v12  ;;  %285 = vst.msk [vmem:[#allocation3] sm:$0x1] %vm284_vm2, %v2689_v10 }
 0x31c   : > { %v3490_v30 = vpop.eup %2519  ;;  %283 = vst.msk [vmem:[#allocation2] sm:$0xff] %vm282_vm1, %v2689_v10 }
 0x31d   : > { %v3492_v34 = vpop.eup %2521  ;;  %v1419_v18 = vmul.f32 1.442695, %v1360_v43  ;;  %v1471_v22 = vsel %vm326_vm0, %v3490_v30, 0.0 }
 0x31e   : > { %1472 = vadd.xlane.f32.xlu1 %v1471_v22  ;;  %v1498_v55 = vsel %vm326_vm0, %v3492_v34, 0.0  ;;  %v1317_v59 = vpop.xlane.xlu0 %1316 }
 0x31f   : > { %2531 = vpow2.f32 %v1419_v18  ;;  %1499 = vadd.xlane.f32.xlu0 %v1498_v55  ;;  %v1359_v36 = vsub.f32 %v3357_v63, %v1317_v59 }
 0x320   : > { %v3499_v37 = vpop.eup %2523 }
 0x321   : > { %v3501_v8 = vpop.eup %2525  ;;  %v1417_v33 = vmul.f32 1.442695, %v1359_v36  ;;  %v1474_v50 = vsel %vm326_vm0, %v3499_v37, 0.0 }
 0x322   : > { %1475 = vadd.xlane.f32.xlu1 %v1474_v50  ;;  %v1495_v15 = vsel %vm326_vm0, %v3501_v8, 0.0  ;;  %v1326_v54 = vpop.xlane.xlu0 %1325 }
 0x323   : > { %2533 = vpow2.f32 %v1417_v33  ;;  %1496 = vadd.xlane.f32.xlu0 %v1495_v15  ;;  %v1362_v61 = vsub.f32 %v3362_v19, %v1326_v54 }
 0x324   : > { %v3508_v1 = vpop.eup %2527 }
 0x325   : > { %v1423_v63 = vmul.f32 1.442695, %v1362_v61  ;;  %v1504_v60 = vsel %vm326_vm0, %v3508_v1, 0.0 }
 0x326   : > { %v1323_v21 = vpop.xlane.xlu0 %1322 }
 0x327   : > { %2535 = vpow2.f32 %v1423_v63  ;;  %1505 = vadd.xlane.f32.xlu0 %v1504_v60  ;;  %v1361_v14 = vsub.f32 %v3367_v28, %v1323_v21 }
 0x328   : > { %v3513_v56 = vpop.eup %2529 }
 0x329   : > { %v1421_v51 = vmul.f32 1.442695, %v1361_v14  ;;  %v1501_v2 = vsel %vm326_vm0, %v3513_v56, 0.0 }
 0x32a   : > { %v1329_v5 = vpop.xlane.xlu0 %1328 }
 0x32b   : > { %2537 = vpow2.f32 %v1421_v51  ;;  %1502 = vadd.xlane.f32.xlu0 %v1501_v2  ;;  %v1363_v17 = vsub.f32 %v3372_v39, %v1329_v5 }
 0x32c   : > { %v3517_v19 = vpop.eup %2531 }
 0x32d   : > { %v1510_v29 = vsel %vm326_vm0, %v3517_v19, 0.0  ;;  %v1425_v46 = vmul.f32 1.442695, %v1363_v17 }
 0x32e   : > { %v1332_v31 = vpop.xlane.xlu0 %1331 }
 0x32f   : > { %1511 = vadd.xlane.f32.xlu0 %v1510_v29  ;;  %v1364_v28 = vsub.f32 %v3377_v49, %v1332_v31 }
 0x330   : > { %v3523_v44 = vpop.eup %2533 }
 0x331   : > { %v1427_v25 = vmul.f32 1.442695, %v1364_v28  ;;  %v1507_v48 = vsel %vm326_vm0, %v3523_v44, 0.0 }
 0x333   : > { %2539 = vpow2.f32 %v1427_v25  ;;  %1508 = vadd.xlane.f32.xlu0 %v1507_v48 }
 0x334   : > { %v3527_v41 = vpop.eup %2535  ;;  %2541 = vpow2.f32 %v1425_v46 }
 0x335   : > { %v1516_v39 = vsel %vm326_vm0, %v3527_v41, 0.0 }
 0x337   : > { %1517 = vadd.xlane.f32.xlu0 %v1516_v39 }
 0x338   : > { %v3531_v40 = vpop.eup %2537 }
 0x339   : > { %v1513_v49 = vsel %vm326_vm0, %v3531_v40, 0.0 }
 0x33b   : > { %1514 = vadd.xlane.f32.xlu0 %v1513_v49 }
 0x340   : > { %v3535_v26 = vpop.eup %2539 }
 0x341   : > { %v1522_v27 = vsel %vm326_vm0, %v3535_v26, 0.0  ;;  %v3539_v24 = vpop.eup %2541 }
 0x342   : > { %1523 = vadd.xlane.f32.xlu0 %v1522_v27  ;;  %v1519_v23 = vsel %vm326_vm0, %v3539_v24, 0.0 }
 0x346   : > { %1520 = vadd.xlane.f32.xlu0 %v1519_v23 }
 0x36f   : > { %v1434_v53 = vpop.xlane.xlu1 %1433 }
 0x373   : > { %v1431_v12 = vpop.xlane.xlu1 %1430 }
 0x374   : > { %2543 = vrcp.f32 %v1431_v12 }
 0x375   : > { %2545 = vrcp.f32 %v1434_v53 }
 0x377   : > { %v1440_v43 = vpop.xlane.xlu1 %1439 }
 0x37b   : > { %v1437_v18 = vpop.xlane.xlu1 %1436 }
 0x37c   : > { %2547 = vrcp.f32 %v1437_v18 }
 0x37d   : > { %2549 = vrcp.f32 %v1440_v43 }
 0x37f   : > { %v1446_v22 = vpop.xlane.xlu1 %1445 }
 0x381   : > { %v2544_v36 = vpop.eup %2543 }
 0x382   : > { %v2546_v50 = vpop.eup %2545  ;;  %v1526_v54 = vmul.f32 %v2544_v36, %v3393_v13 }
 0x383   : > { %v1443_v55 = vpop.xlane.xlu1 %1442  ;;  %v3549_v60 = vmul.f32 %v2546_v50, %v3388_v45 }
 0x384   : > { %2551 = vrcp.f32 %v1443_v55  ;;  %v1727_v51 = vsel %vm326_vm0, %v1526_v54, 0.0 }
 0x385   : > { %2553 = vrcp.f32 %v1446_v22  ;;  %v1728_v13 = vsel %vm326_vm0, %v3549_v60, 0.0 }
 0x386   : > { %v1729_v45 = vadd.f32 %v1728_v13, %v1727_v51 }
 0x387   : > { %v1452_v59 = vpop.xlane.xlu1 %1451 }
 0x389   : > { %v2548_v15 = vpop.eup %2547 }
 0x38a   : > { %v3552_v21 = vmul.f32 %v2548_v15, %v3403_v16  ;;  %v2550_v14 = vpop.eup %2549 }
 0x38b   : > { %v1449_v33 = vpop.xlane.xlu1 %1448  ;;  %v3560_v16 = vmul.f32 %v2550_v14, %v3398_v47 }
 0x38c   : > { %2555 = vrcp.f32 %v1449_v33  ;;  %v1730_v29 = vsel %vm326_vm0, %v3552_v21, 0.0 }
 0x38d   : > { %2557 = vrcp.f32 %v1452_v59  ;;  %v1731_v46 = vadd.f32 %v1730_v29, %v1729_v45  ;;  %v1732_v49 = vsel %vm326_vm0, %v3560_v16, 0.0 }
 0x38f   : > { %v1458_v61 = vpop.xlane.xlu1 %1457  ;;  %v1733_v53 = vadd.f32 %v1732_v49, %v1731_v46 }
 0x390   : > { %v1482_v63 = vpop.xlane.xlu0 %1481 }
 0x391   : > { %v2552_v2 = vpop.eup %2551  ;;  %2559 = vrcp.f32 %v1482_v63 }
 0x392   : > { %v3563_v31 = vmul.f32 %v2552_v2, %v3415_v35  ;;  %v2554_v25 = vpop.eup %2553 }
 0x393   : > { %v1455_v5 = vpop.xlane.xlu1 %1454  ;;  %v3570_v35 = vmul.f32 %v2554_v25, %v3409_v6 }
 0x394   : > { %2561 = vrcp.f32 %v1455_v5  ;;  %v1479_v17 = vpop.xlane.xlu0 %1478  ;;  %v1734_v27 = vsel %vm326_vm0, %v3563_v31, 0.0 }
 0x395   : > { %2563 = vrcp.f32 %v1479_v17  ;;  %v1735_v43 = vadd.f32 %v1734_v27, %v1733_v53  ;;  %v1736_v36 = vsel %vm326_vm0, %v3570_v35, 0.0 }
 0x396   : > { %2565 = vrcp.f32 %v1458_v61 }
 0x397   : > { %v1464_v28 = vpop.xlane.xlu1 %1463  ;;  %v1737_v15 = vadd.f32 %v1736_v36, %v1735_v43 }
 0x398   : > { %v1488_v48 = vpop.xlane.xlu0 %1487 }
 0x399   : > { %v2556_v39 = vpop.eup %2555  ;;  %2567 = vrcp.f32 %v1488_v48 }
 0x39a   : > { %v3573_v12 = vmul.f32 %v2556_v39, %v3427_v3  ;;  %v2558_v18 = vpop.eup %2557 }
 0x39b   : > { %v1461_v23 = vpop.xlane.xlu1 %1460  ;;  %v3580_v3 = vmul.f32 %v2558_v18, %v3421_v32 }
 0x39c   : > { %2569 = vrcp.f32 %v1461_v23  ;;  %v1485_v47 = vpop.xlane.xlu0 %1484  ;;  %v1738_v33 = vsel %vm326_vm0, %v3573_v12, 0.0 }
 0x39d   : > { %2571 = vrcp.f32 %v1485_v47  ;;  %v1739_v51 = vadd.f32 %v1738_v33, %v1737_v15  ;;  %v1740_v32 = vsel %vm326_vm0, %v3580_v3, 0.0 }
 0x39e   : > { %2573 = vrcp.f32 %v1464_v28  ;;  %v2560_v55 = vpop.eup %2559 }
 0x39f   : > { %v1470_v22 = vpop.xlane.xlu1 %1469  ;;  %v3590_v13 = vmul.f32 %v2560_v55, %v3435_v52 }
 0x3a0   : > { %v1494_v59 = vpop.xlane.xlu0 %1493  ;;  %2575 = vrcp.f32 %v1470_v22 }
 0x3a1   : > { %v2562_v50 = vpop.eup %2561  ;;  %2577 = vrcp.f32 %v1494_v59  ;;  %v2380_v52 = vpack.i.bf16 %v3549_v60, %v3590_v13 }
 0x3a2   : > { %v2564_v6 = vpop.eup %2563  ;;  %v3583_v61 = vmul.f32 %v2562_v50, %v3443_v62 }
 0x3a3   : > { %v1467_v63 = vpop.xlane.xlu1 %1466  ;;  %v3586_v14 = vmul.f32 %v2564_v6, %v3445_v11  ;;  %v2566_v5 = vpop.eup %2565  ;;  %v1741_v11 = vadd.f32 %v1740_v32, %v1739_v51 }
 0x3a4   : > { %2579 = vrcp.f32 %v1467_v63  ;;  %v1491_v2 = vpop.xlane.xlu0 %1490  ;;  %v1742_v62 = vsel %vm326_vm0, %v3583_v61, 0.0  ;;  %v3597_v46 = vmul.f32 %v2566_v5, %v3433_v7 }
 0x3a5   : > { %2581 = vrcp.f32 %v1491_v2  ;;  %v2378_v17 = vpack.i.bf16 %v1526_v54, %v3586_v14  ;;  %v1743_v54 = vadd.f32 %v1742_v62, %v1741_v11 }
 0x3a6   : > { %v2568_v45 = vpop.eup %2567  ;;  %v1744_v7 = vsel %vm326_vm0, %v3597_v46, 0.0 }
 0x3a7   : > { %2379 = vxpose.xlu0.b32.start [1/16] (narrow) %v2378_v17, 8  ;;  %v1473_v29 = vpop.xlane.xlu1 %1472  ;;  %v1745_v43 = vadd.f32 %v1744_v7, %v1743_v54 }
 0x3a8   : > { %2583 = vrcp.f32 %v1473_v29  ;;  %v1500_v28 = vpop.xlane.xlu0 %1499 }
 0x3a9   : > { %v2570_v25 = vpop.eup %2569  ;;  %2585 = vrcp.f32 %v1500_v28 }
 0x3aa   : > { %v2572_v48 = vpop.eup %2571  ;;  %v3602_v39 = vmul.f32 %v2570_v25, %v3463_v9  ;;  %v1564_v9 = vmul.f32 %v2568_v45, %v3455_v42 }
 0x3ab   : > { %v2574_v49 = vpop.eup %2573  ;;  %2381 = vxpose.xlu0.b32.cont [2/16] (narrow) %v2380_v52, 8  ;;  %v1476_v27 = vpop.xlane.xlu1 %1475  ;;  %v1562_v23 = vmul.f32 %v2572_v48, %v3465_v4 }
 0x3ac   : > { %2587 = vrcp.f32 %v1476_v27  ;;  %v1497_v53 = vpop.xlane.xlu0 %1496  ;;  %v1746_v47 = vsel %vm326_vm0, %v3602_v39, 0.0  ;;  %v3612_v18 = vmul.f32 %v2574_v49, %v3453_v20  ;;  %v2384_v33 = vpack.i.bf16 %v3560_v16, %v1564_v9 }
 0x3ad   : > { %2589 = vrcp.f32 %v1497_v53  ;;  %v2382_v60 = vpack.i.bf16 %v3552_v21, %v1562_v23  ;;  %v2576_v22 = vpop.eup %2575  ;;  %v1747_v4 = vadd.f32 %v1746_v47, %v1745_v43  ;;  %v1762_v43 = vsel %vm326_vm0, %v1562_v23, 0.0 }
 0x3ae   : > { %v2578_v55 = vpop.eup %2577  ;;  %v1748_v15 = vsel %vm326_vm0, %v3612_v18, 0.0  ;;  %v3621_v42 = vmul.f32 %v2576_v22, %v3472_v38  ;;  %v1764_v22 = vsel %vm326_vm0, %v1564_v9, 0.0 }
 0x3af   : > { %2383 = vxpose.xlu0.b32.cont [3/16] (narrow) %v2382_v60, 8  ;;  %v1749_v6 = vadd.f32 %v1748_v15, %v1747_v4  ;;  %v1568_v5 = vmul.f32 %v2578_v55, %v3474_v58 }
 0x3b0   : > { %v1506_v59 = vpop.xlane.xlu0 %1505  ;;  %v1752_v38 = vsel %vm326_vm0, %v3621_v42, 0.0 }
 0x3b1   : > { %v2580_v36 = vpop.eup %2579  ;;  %2591 = vrcp.f32 %v1506_v59  ;;  %v2388_v45 = vpack.i.bf16 %v3570_v35, %v1568_v5  ;;  %v1758_v35 = vsel %vm326_vm0, %v3586_v14, 0.0  ;;  %v1768_v23 = vsel %vm326_vm0, %v1568_v5, 0.0 }
 0x3b2   : > { %v2582_v50 = vpop.eup %2581  ;;  %v3618_v21 = vmul.f32 %v2580_v36, %v3481_v57 }
 0x3b3   : > { %2385 = vxpose.xlu0.b32.cont [4/16] (narrow) %v2384_v33, 8  ;;  %v1566_v20 = vmul.f32 %v2582_v50, %v3483_v0 }
 0x3b4   : > { %v1503_v63 = vpop.xlane.xlu0 %1502  ;;  %v1750_v51 = vsel %vm326_vm0, %v3618_v21, 0.0 }
 0x3b5   : > { %v2584_v16 = vpop.eup %2583  ;;  %2593 = vrcp.f32 %v1503_v63  ;;  %v2386_v2 = vpack.i.bf16 %v3563_v31, %v1566_v20  ;;  %v1751_v57 = vadd.f32 %v1750_v51, %v1749_v6 }
 0x3b6   : > { %v3631_v17 = vmul.f32 %v2584_v16, %v3490_v30  ;;  %v2586_v32 = vpop.eup %2585 }
 0x3b7   : > { %2387 = vxpose.xlu0.b32.cont [5/16] (narrow) %v2386_v2, 8  ;;  %v1753_v0 = vadd.f32 %v1752_v38, %v1751_v57  ;;  %v1572_v48 = vmul.f32 %v2586_v32, %v3492_v34 }
 0x3b8   : > { %v1512_v62 = vpop.xlane.xlu0 %1511  ;;  %v1754_v29 = vsel %vm326_vm0, %v3631_v17, 0.0 }
 0x3b9   : > { %v2588_v11 = vpop.eup %2587  ;;  %v1755_v25 = vadd.f32 %v1754_v29, %v1753_v0  ;;  %2595 = vrcp.f32 %v1512_v62  ;;  %v2392_v7 = vpack.i.bf16 %v3580_v3, %v1572_v48  ;;  %v1766_v3 = vsel %vm326_vm0, %v1566_v20, 0.0 }
 0x3ba   : > { %v2590_v31 = vpop.eup %2589  ;;  %v3637_v58 = vmul.f32 %v2588_v11, %v3499_v37 }
 0x3bb   : > { %2389 = vxpose.xlu0.b32.cont [6/16] (narrow) %v2388_v45, 8  ;;  %v1570_v28 = vmul.f32 %v2590_v31, %v3501_v8  ;;  %v1760_v8 = vsel %vm326_vm0, %v3590_v13, 0.0 }
 0x3bc   : > { %v1509_v30 = vpop.xlane.xlu0 %1508  ;;  %v1756_v52 = vsel %vm326_vm0, %v3637_v58, 0.0 }
 0x3bd   : > { %2597 = vrcp.f32 %v1509_v30  ;;  %v2390_v54 = vpack.i.bf16 %v3573_v12, %v1570_v28  ;;  %v1757_v49 = vadd.f32 %v1756_v52, %v1755_v25  ;;  %v1770_v9 = vsel %vm326_vm0, %v1570_v28, 0.0 }
 0x3be   : > { %v2592_v53 = vpop.eup %2591 }
 0x3bf   : > { %2391 = vxpose.xlu0.b32.cont [7/16] (narrow) %v2390_v54, 8  ;;  %v1759_v37 = vadd.f32 %v1758_v35, %v1757_v49  ;;  %v1576_v13 = vmul.f32 %v2592_v53, %v3508_v1  ;;  %v1772_v1 = vsel %vm326_vm0, %v1572_v48, 0.0 }
 0x3c0   : > { %v1518_v27 = vpop.xlane.xlu0 %1517 }
 0x3c1   : > { %v1761_v47 = vadd.f32 %v1760_v8, %v1759_v37  ;;  %2599 = vrcp.f32 %v1518_v27  ;;  %v1776_v5 = vsel %vm326_vm0, %v1576_v13, 0.0 }
 0x3c2   : > { %v2594_v60 = vpop.eup %2593 }
 0x3c3   : > { %2393 = vxpose.xlu0.b32.cont [8/16] (narrow) %v2392_v7, 8  ;;  %v1574_v34 = vmul.f32 %v2594_v60, %v3513_v56  ;;  %v1763_v12 = vadd.f32 %v1762_v43, %v1761_v47  ;;  %v2396_v56 = vpack.i.bf16 %v3597_v46, %v1576_v13  ;;  %v1726_v47 = vld [vmem:[#allocation3] sm:$0x1] }
 0x3c4   : > { %v1515_v14 = vpop.xlane.xlu0 %1514 }
 0x3c5   : > { %2601 = vrcp.f32 %v1515_v14  ;;  %v2394_v4 = vpack.i.bf16 %v3583_v61, %v1574_v34  ;;  %v1765_v55 = vadd.f32 %v1764_v22, %v1763_v12  ;;  %v1774_v16 = vsel %vm326_vm0, %v1574_v34, 0.0 }
 0x3c6   : > { %v2596_v36 = vpop.eup %2595 }
 0x3c7   : > { %2395 = vxpose.xlu0.b32.cont [9/16] (narrow) %v2394_v4, 8  ;;  %v1767_v59 = vadd.f32 %v1766_v3, %v1765_v55  ;;  %v1580_v63 = vmul.f32 %v2596_v36, %v3517_v19  ;;  %v1803_v55 = vld [vmem:[%s3738_s5] sm:$0xff] }
 0x3c9   : > { %v1769_v33 = vadd.f32 %v1768_v23, %v1767_v59  ;;  %v1780_v11 = vsel %vm326_vm0, %v1580_v63, 0.0 }
 0x3ca   : > { %v2598_v50 = vpop.eup %2597 }
 0x3cb   : > { %2397 = vxpose.xlu0.b32.cont [10/16] (narrow) %v2396_v56, 8  ;;  %v1524_v15 = vpop.xlane.xlu0 %1523  ;;  %v1578_v61 = vmul.f32 %v2598_v50, %v3523_v44  ;;  %v1771_v6 = vadd.f32 %v1770_v9, %v1769_v33  ;;  %v2400_v44 = vpack.i.bf16 %v3612_v18, %v1580_v63 }
 0x3cc   : > { %2603 = vrcp.f32 %v1524_v15 }
 0x3cd   : > { %v2398_v20 = vpack.i.bf16 %v3602_v39, %v1578_v61  ;;  %v1773_v51 = vadd.f32 %v1772_v1, %v1771_v6  ;;  %v1778_v32 = vsel %vm326_vm0, %v1578_v61, 0.0 }
 0x3ce   : > { %v2600_v57 = vpop.eup %2599 }
 0x3cf   : > { %2399 = vxpose.xlu0.b32.cont [11/16] (narrow) %v2398_v20, 8  ;;  %v1521_v46 = vpop.xlane.xlu0 %1520  ;;  %v1775_v2 = vadd.f32 %v1774_v16, %v1773_v51  ;;  %v1584_v29 = vmul.f32 %v2600_v57, %v3527_v41 }
 0x3d0   : > { %2605 = vrcp.f32 %v1521_v46 }
 0x3d1   : > { %v1777_v38 = vadd.f32 %v1776_v5, %v1775_v2  ;;  %v2404_v31 = vpack.i.bf16 %v3621_v42, %v1584_v29  ;;  %v1784_v52 = vsel %vm326_vm0, %v1584_v29, 0.0  ;;  %v2690_v5 = vmov 1983009808  }
 0x3d2   : > { %v2602_v0 = vpop.eup %2601  ;;  %v1834_v57 = vunpack.c.l.s4 %v2690_v5 }
 0x3d3   : > { %2401 = vxpose.xlu0.b32.cont [12/16] (narrow) %v2400_v44, 8  ;;  %v1582_v19 = vmul.f32 %v2602_v0, %v3531_v40  ;;  %v1779_v39 = vadd.f32 %v1778_v32, %v1777_v38  ;;  %v1836_v44 = vlaneseq  ;;  %v2691_v38 = vmov 1934713408  }
 0x3d4   : > { %v1849_v0 = vunpack.c.l.s4 %v2691_v38  ;;  %v1835_v32 = vunpack.c.0.s8 %v1834_v57 }
 0x3d5   : > { %v2402_v62 = vpack.i.bf16 %v3618_v21, %v1582_v19  ;;  %v1781_v45 = vadd.f32 %v1780_v11, %v1779_v39  ;;  %v1782_v18 = vsel %vm326_vm0, %v1582_v19, 0.0  ;;  %v1837_v19 = vshrl.u32 %v1836_v44, 7 }
 0x3d6   : > { %v1850_v39 = vunpack.c.0.s8 %v1849_v0  ;;  %vm1933_vm5 = vcmp.lt.s32.totalorder %v1836_v44, 256 }
 0x3d7   : > { %2403 = vxpose.xlu0.b32.cont [13/16] (narrow) %v2402_v62, 8  ;;  %v1783_v25 = vadd.f32 %v1782_v18, %v1781_v45  ;;  %v1838_v29 = vsub.s32 %v1835_v32, %v1837_v19 }
 0x3d9   : > { %v2604_v28 = vpop.eup %2603  ;;  %v1785_v54 = vadd.f32 %v1784_v52, %v1783_v25 }
 0x3da   : > { %v1588_v21 = vmul.f32 %v2604_v28, %v3535_v26 }
 0x3db   : > { %2405 = vxpose.xlu0.b32.cont [14/16] (narrow) %v2404_v31, 8  ;;  %v1853_v31 = vsub.s32 %v1850_v39, %v1837_v19 }
 0x3dc   : > { %v1788_v42 = vsel %vm326_vm0, %v1588_v21, 0.0  ;;  %v2408_v37 = vpack.i.bf16 %v3637_v58, %v1588_v21  ;;  %v1589_v58 = vld [vmem:[#allocation2] sm:$0xff] }
 0x3dd   : > { %v2606_v30 = vpop.eup %2605 }
 0x3de   : > { %v1586_v40 = vmul.f32 %v2606_v30, %v3539_v24 }
 0x3e0   : > { %v2406_v41 = vpack.i.bf16 %v3631_v17, %v1586_v40  ;;  %v1786_v48 = vsel %vm326_vm0, %v1586_v40, 0.0 }
 0x3e1   : > { %v1787_v49 = vadd.f32 %v1786_v48, %v1785_v54 }
 0x3e2   : > { %2407 = vxpose.xlu0.b32.cont [15/16] (narrow) %v2406_v41, 8 }
 0x3e3   : > { %v1789_v35 = vadd.f32 %v1788_v42, %v1787_v49 }
 0x3e5   : > { %v1790_v8 = vrot.slane %v1789_v35, 4 }
 0x3e6   : > { %2409 = vxpose.xlu0.b32.end [16/16] (narrow) %v2408_v37, 8 }
 0x3e7   : > { %v1791_v27 = vadd.f32 %v1790_v8, %v1789_v35 }
 0x3e9   : > { %v1792_v53 = vrot.slane %v1791_v27, 2 }
 0x3eb   : > { %v1793_v7 = vadd.f32 %v1792_v53, %v1791_v27 }
 0x3ed   : > { %v1794_v24 = vrot.slane %v1793_v7, 1 }
 0x3ef   : > { %v1795_v26 = vadd.f32 %v1794_v24, %v1793_v7  ;;  %v2695_v7 = vmov 1966171168  }
 0x3f0   : > { %v1917_v24 = vunpack.c.l.s4 %v2695_v7 }
 0x3f1   : > { %v1796_v60 = vadd.f32 %v1795_v26, %v1726_v47 }
 0x3f2   : > { %v1918_v26 = vunpack.c.0.s8 %v1917_v24 }
 0x3f3   : > { %1798 = vst.msk [vmem:[#allocation3] sm:$0x1] %vm284_vm2, %v1796_v60 }
 0x3fa   : > { %v2098_v17 = vld [vmem:[#allocation3] ss:$0 sm:$0xff] }
 0x3fb   : > { %1810 = vbcast.lane.b32.xlu1 %v2098_v17, 256 }
 0x426   : > { %v2410_v43 = vpop.trf.xlu0 }
 0x427   : > { %v2414_v34 = vunpack.i.h.bf16 %v2410_v43  ;;  %v2411_v12 = vunpack.i.l.bf16 %v2410_v43 }
 0x429   : > { %1718 = vmatprep.mubr.f32.mxu0 %v2411_v12 }
 0x42a   : > { %1719 = vmatmul.mubr.f32.vlgmr.msra.gmra.mxu0 %v2414_v34  ;;  %v1921_v34 = vsub.s32 %v1918_v26, %v1837_v19 }
 0x46d   : > { %v1811_v3 = vpop.permute.xlu1 %1810 }
 0x46e   : > { %v1812_v59 = vmul.f32 %v1811_v3, %v1803_v55 }
 0x4ea   : > { %v2207_v22 = vpop.f32.mrf.mxu0 }
 0x4ec   : > { %v2208_v14 = vpop.f32.mrf.mxu0 }
 0x4ed   : > { %v2209_v4 = vadd.f32 %v2208_v14, %v2207_v22 }
 0x4ef   : > { %v1724_v13 = vadd.f32 %v2209_v4, %v1589_v58 }
 0x4f1   : > { %1725 = vst.msk [vmem:[#allocation2] sm:$0xff] %vm282_vm1, %v1724_v13 }
 0x4f8   : > { %v1802_v23 = vld [vmem:[#allocation2] sm:$0xff] }
 0x4f9   : > { %v1813_v36 = vsub.f32 %v1802_v23, %v1812_v59 }
 0x4fb   : > { %v1814_v56 = vmul.f32 %v1813_v36, %v1813_v36 }
 0x4fd   : > { %v1815_v33 = vsel %vm282_vm1, %v1814_v56, 0.0 }
 0x4fe   : > { %1816 = vadd.xlane.f32.xlu1 %v1815_v33 }
 0x587   : > { %v1817_v50 = vpop.xlane.xlu1 %1816 }
 0x588   : > { %v1818_v9 = vmax.f32 %v1817_v50, 1e-24 }
 0x58a   : > { %2607 = vrsqrt.f32 %v1818_v9 }
 0x597   : > { %v2608_v15 = vpop.eup %2607 }
 0x598   : > { %v1821_v61 = vmul.f32 %v2608_v15, %v2608_v15  ;;  %v1820_v62 = vmul.f32 %v2608_v15, %v1813_v36 }
 0x59a   : > { %v1822_v6 = vmul.f32 %v1821_v61, %v1817_v50 }
 0x59c   : > { %v1823_v1 = vrot.slane %v1822_v6, 4 }
 0x59e   : > { %v1824_v20 = vadd.f32 %v1823_v1, %v1822_v6 }
 0x5a0   : > { %v1825_v63 = vrot.slane %v1824_v20, 2 }
 0x5a2   : > { %v1826_v51 = vadd.f32 %v1825_v63, %v1824_v20 }
 0x5a4   : > { %v1827_v16 = vrot.slane %v1826_v51, 1 }
 0x5a6   : > { %v1828_v46 = vadd.f32 %v1827_v16, %v1826_v51 }
 0x5a8   : > { %v1829_v2 = vmax.f32 %v1828_v46, 1e-24 }
 0x5aa   : > { %2609 = vrsqrt.f32 %v1829_v2 }
 0x5b7   : > { %v2610_v11 = vpop.eup %2609 }
 0x5b8   : > { %v1831_v45 = vmul.f32 %v2610_v11, %v1820_v62 }
 0x5ba   : > { %v1839_v18 = vrot.slane %v1831_v45, %v1838_v29  ;;  %v1832_v28 = vcombine.high %v1831_v45, %v2689_v10 }
 0x5bc   : > { %v1854_v25 = vrot.slane %v1839_v18, %v1853_v31  ;;  %v1847_v52 = vcombine.high %v1839_v18, %v2689_v10  ;;  %v1846_v40 = vrot.slane %v1832_v28, %v1838_v29 }
 0x5be   : > { %v1877_v30 = vcombine.high %v1854_v25, %v2689_v10  ;;  %v1861_v21 = vrot.slane %v1847_v52, %v1853_v31  ;;  %v1869_v54 = vrot.slane %v1846_v40, %v1853_v31  ;;  %v1862_v48 = vcombine.high %v1846_v40, %v2689_v10 }
 0x5c0   : > { %1882 = vrot.lane.b32.xlu1 %v1877_v30, %s2692_s18  ;;  %v1879_v41 = vcombine.high %v1869_v54, %v2689_v10  ;;  %v1876_v49 = vrot.slane %v1862_v48, %v1853_v31  ;;  %v1878_v42 = vcombine.high %v1861_v21, %v2689_v10 }
 0x5c2   : > { %v1880_v35 = vcombine.high %v1876_v49, %v2689_v10 }
 0x5c4   : > { %1886 = vrot.lane.b32.xlu1 %v1861_v21, %s2693_s19 }
 0x5c8   : > { %1894 = vrot.lane.b32.xlu1 %v1879_v41, %s2692_s18  ;;  %s2615_s18 = sshll.u32 %s2696_s17, 4  ;;  %s2616_s18 = int_to_ptr.vmem [resolvable:$false] %s2615_s18 }
 0x5c9   : > { %s2617_s24 = scalar_lea.vmem %s2616_s18, 64  ;;  %p2618_p1 = scmp.lt.s32.totalorder %s1952_s11, %s2616_s18 }
 0x5ca   : > { %p2619_p2 = scmp.lt.s32.totalorder %s2617_s24, %s2611_s16 }
 0x5cc   : > { %1898 = vrot.lane.b32.xlu1 %v1876_v49, %s2693_s19  ;;  %p2620_p3 = por %p2619_p2, %p2618_p1 }
 0x5ce   : > { %p2621_p5 = pnand %p2620_p3, %p2614_p0 }
 0x5d0   : > { %1890 = vrot.lane.b32.xlu1 %v1878_v42, %s2694_s20 }
 0x5d4   : > { %1902 = vrot.lane.b32.xlu1 %v1880_v35, %s2694_s20 }
 0x632   : > { %v1883_v37 = vpop.permute.xlu1 %1882 }
 0x633   : > { %v1905_v60 = vsel %vm282_vm1, %v1854_v25, %v1883_v37 }
 0x636   : > { %v1887_v8 = vpop.permute.xlu1 %1886 }
 0x637   : > { %v1907_v43 = vsel %vm1906_vm3, %v1905_v60, %v1887_v8 }
 0x63a   : > { %v1895_v27 = vpop.permute.xlu1 %1894 }
 0x63b   : > { %v1910_v17 = vsel %vm282_vm1, %v1869_v54, %v1895_v27 }
 0x63e   : > { %v1899_v53 = vpop.permute.xlu1 %1898 }
 0x63f   : > { %v1911_v10 = vsel %vm1906_vm3, %v1910_v17, %v1899_v53 }
 0x642   : > { %v1891_v47 = vpop.permute.xlu1 %1890 }
 0x643   : > { %v1909_v22 = vsel %vm1908_vm4, %v1907_v43, %v1891_v47 }
 0x646   : > { %v1903_v12 = vpop.permute.xlu1 %1902 }
 0x647   : > { %v1912_v58 = vsel %vm1908_vm4, %v1911_v10, %v1903_v12 }
 0x648   : > { %v1915_v14 = vcombine.low %v1909_v22, %v1912_v58 }
 0x64a   : > { %v1922_v4 = vrot.slane %v1915_v14, %v1921_v34 }
 0x64c   : > { %v1929_v13 = vrot.slane %v1922_v4, %v1921_v34 }
 0x64e   : > { %1935 = vst.msk [vmem:[%s267_s8] sm:$0x3] %vm1933_vm5, %v1929_v13 }
 0x64f   : > { %2624 = shalt.err (!%p2621_p5)
}
 0x650   : > { %s2625_s19 = scalar_lea.hbm %s1949_s14, 32  ;;  %s2629_s28 = scalar_lea.hbm %s3739_s6, 64 }
 0x651   : > { %p2626_p6 = scmp.ne.s32.totalorder %s1949_s14, %s2625_s19  ;;  %p2630_p10 = scmp.lt.s32.totalorder %s1949_s14, %s3739_s6 }
 0x652   : > { %p2631_p11 = scmp.lt.s32.totalorder %s2629_s28, %s2625_s19 }
 0x653   : > { %p2627_p7 = pnand %p2626_p6, %p2772_p4 }
 0x654   : > { %p2632_p12 = por %p2631_p11, %p2630_p10 }
 0x655   : > { %p2628_p9 = pneg %p2627_p7 }
 0x657   : > { %p2633_p13 = pnand %p2632_p12, %p2628_p9 }
 0x659   : > { %2636 = shalt.err (!%p2633_p13)
}
 0x65a   : > { %2316 = dma.vmem_to_hbm [thread:$0]  (%p2772_p4), %s1952_s11, 32, %s1949_s14, %s1937_s15  }
 0x65b PF: > { %p2322_p0 = scmp.ge.s32.totalorder %s2687_s26, 2  ;;  %s1963_s12 = sand.u32 1, %s2667_s21  }
 0x65c   : > { %s1964_s13 = scalar_lea.sflag [#allocation5], %s1963_s12 }
 0x65d   : > { %p2319_p1 = pnand %p2322_p0, %p2779_p8 }
 0x65f   : > { %p2320_p2 = pneg %p2319_p1 }
 0x661   : > { %2662 = dma.done.wait (%p2320_p2), %s1964_s13, 32  }
 0x662   : > { %2664 = vsyncadd (%p2320_p2), %s1964_s13, 4294967264  ;;  %s19_s26 = sadd.s32 1, %s2687_s26   ;;  %s3742_s21 = smov %s2671_s22 }
 0x663   : > { %p16_p3 = scmp.ge.s32.totalorder %s19_s26, 4   ;;  %s3743_s22 = smov %s2675_s23 }
 0x664   : > { %s3744_s23 = smov %s2785_s10  ;;  %s3745_s24 = smov %s2683_s25 }
 0x665   : > { %s3746_s25 = smov %s3748_s29  ;;  %18 = sbr.rel (!%p16_p3) target bundleno = 4 (0x4), region = 87 }
 0x66a   :  { %1969 = vsyncpa [#allocation5], 1 }
 0x66b   :  { %1971 = vsyncpa [#allocation5 + $0x1], 1 }

</bundles_post_ra>
